<compile_context>
chip_gen: v7x
topology: tpu7x:2x2x1
jax: 0.10.0
libtpu: 0.0.40
codegen_flags: <defaults>
</compile_context>

<pallas_src>
import functools

import jax
import jax.numpy as jnp
from jax.experimental import pallas as pl
from jax.experimental.pallas import tpu as pltpu

# -------------------- model hyper-parameters (small, synthetic) -----------------
NUM_NODES  = 256     # data.num_nodes
DIM        = 128     # model_cfg.dim
DIM_HID    = 128     # context_encoder.dim_hid
NUM_CTXT   = 4       # number of distinct contexts
CTXT_PAD   = 8       # context table padded to 8 sublanes for the (8, 128) tile rule
NUM_LAYERS = 2       # model_cfg.num_layers
HEADS      = 2       # model_cfg.heads  -- TODO(synk): attention heads of the unspecified GNN
                     # are not reproducible from the wrapper; aggregation is mean-normalized.


# ------------------------------ fused Pallas kernel ------------------------------
def _cone_fused_kernel(idx_ref,                  # SMEM scalar prefetch: (1,) int32 ctxt index
                       ctxt_ref,                 # (CTXT_PAD, DIM)  f32
                       ce_w1_ref, ce_b1_ref,     # (DIM, DIM_HID) f32, (1, DIM_HID) f32
                       ce_w2_ref, ce_b2_ref,     # (DIM_HID, DIM) f32, (1, DIM)     f32
                       a_ref,                    # (N, N)    bf16  row-normalized adjacency
                       h0_ref,                   # (N, DIM)  bf16  node embedding table
                       w_ref,                    # (L, DIM, DIM) bf16 stacked layer weights
                       b_ref,                    # (L, 1, DIM)   f32  stacked layer biases
                       o_ref,                    # (N, DIM)  f32
                       *, num_layers: int):
    # ---- context encoder prologue: cond = relu(e @ W1 + b1) @ W2 + b2 ----------
    idx = idx_ref[0]
    tbl = ctxt_ref[...]                                                  # (CTXT_PAD, DIM)
    row_ids = jax.lax.broadcasted_iota(jnp.int32, tbl.shape, 0)
    e = jnp.sum(jnp.where(row_ids == idx, tbl, 0.0), axis=0, keepdims=True)  # (1, DIM)
    h1 = jnp.dot(e, ce_w1_ref[...], preferred_element_type=jnp.float32)
    h1 = jnp.maximum(h1 + ce_b1_ref[...], 0.0)
    cond = jnp.dot(h1, ce_w2_ref[...], preferred_element_type=jnp.float32) + ce_b2_ref[...]

    # ---- GNN decoder: H stays resident in VMEM across all layers ---------------
    a = a_ref[...]                                                       # (N, N)   bf16
    h = h0_ref[...]                                                      # (N, DIM) bf16
    for layer in range(num_layers):                                      # static unroll (L=2)
        bc = b_ref[layer] + cond                                         # (1, DIM) f32
        m = jnp.dot(a, h, preferred_element_type=jnp.float32)            # (N, DIM) f32
        z = jnp.dot(m.astype(jnp.bfloat16), w_ref[layer],
                    preferred_element_type=jnp.float32) + bc             # (N, DIM) f32
        if layer < num_layers - 1:
            h = jnp.maximum(z, 0.0).astype(jnp.bfloat16)
        else:
            o_ref[...] = z


# ------------------------------ wrapper -------------------------------------------
def cone_forward(params, a_hat, ctxt_idx):
    """CONE.forward: cond_emb = cond_embs(ctxt); z = decoder(A, cond_emb=cond_emb)."""
    n, d = params["node_emb"].shape
    dh = params["ce_w1"].shape[1]
    num_layers = params["gnn_w"].shape[0]

    # pad the ctxt table to 8 sublanes; in-kernel masked row-select picks the real row
    tbl = params["ctxt_table"]
    tbl_pad = jnp.zeros((CTXT_PAD, d), jnp.float32).at[: tbl.shape[0]].set(tbl)

    # bf16 operands for the MXU hot path; accumulation stays fp32 in-kernel
    a_bf = a_hat.astype(jnp.bfloat16)
    h0_bf = params["node_emb"].astype(jnp.bfloat16)
    w_bf = params["gnn_w"].astype(jnp.bfloat16)

    idx = jnp.asarray([ctxt_idx], dtype=jnp.int32)

    kernel = functools.partial(_cone_fused_kernel, num_layers=num_layers)
    grid_spec = pltpu.PrefetchScalarGridSpec(
        num_scalar_prefetch=1,
        grid=(1,),
        in_specs=[
            pl.BlockSpec((CTXT_PAD, d), lambda i, s: (0, 0)),
            pl.BlockSpec((d, dh),       lambda i, s: (0, 0)),
            pl.BlockSpec((1, dh),       lambda i, s: (0, 0)),
            pl.BlockSpec((dh, d),       lambda i, s: (0, 0)),
            pl.BlockSpec((1, d),        lambda i, s: (0, 0)),
            pl.BlockSpec((n, n),        lambda i, s: (0, 0)),
            pl.BlockSpec((n, d),        lambda i, s: (0, 0)),
            pl.BlockSpec((num_layers, d, d), lambda i, s: (0, 0, 0)),
            pl.BlockSpec((num_layers, 1, d), lambda i, s: (0, 0, 0)),
        ],
        out_specs=pl.BlockSpec((n, d), lambda i, s: (0, 0)),
    )
    return pl.pallas_call(
        kernel,
        out_shape=jax.ShapeDtypeStruct((n, d), jnp.float32),
        grid_spec=grid_spec,
        compiler_params=pltpu.CompilerParams(dimension_semantics=("arbitrary",)),
    )(idx, tbl_pad,
      params["ce_w1"], params["ce_b1"], params["ce_w2"], params["ce_b2"],
      a_bf, h0_bf, w_bf, params["gnn_b"])


# ------------------------------ pure-JAX reference ---------------------------------
def cone_reference(params, a_hat, ctxt_idx):
    e = params["ctxt_table"][ctxt_idx][None, :]
    h1 = jnp.maximum(e @ params["ce_w1"] + params["ce_b1"], 0.0)
    cond = h1 @ params["ce_w2"] + params["ce_b2"]
    h = params["node_emb"]
    num_layers = params["gnn_w"].shape[0]
    for layer in range(num_layers):
        z = (a_hat @ h) @ params["gnn_w"][layer] + params["gnn_b"][layer] + cond
        h = jnp.maximum(z, 0.0) if layer < num_layers - 1 else z
    return h


# ------------------------------ deterministic setup ---------------------------------
def init_params(key):
    ks = jax.random.split(key, 5)
    scale = 0.1
    return {
        "ctxt_table": scale * jax.random.normal(ks[0], (NUM_CTXT, DIM), jnp.float32),
        "ce_w1": scale * jax.random.normal(ks[1], (DIM, DIM_HID), jnp.float32),
        "ce_b1": jnp.zeros((1, DIM_HID), jnp.float32),
        "ce_w2": scale * jax.random.normal(ks[2], (DIM_HID, DIM), jnp.float32),
        "ce_b2": jnp.zeros((1, DIM), jnp.float32),
        "node_emb": scale * jax.random.normal(ks[3], (NUM_NODES, DIM), jnp.float32),
        "gnn_w": scale * jax.random.normal(ks[4], (NUM_LAYERS, DIM, DIM), jnp.float32),
        "gnn_b": jnp.zeros((NUM_LAYERS, 1, DIM), jnp.float32),
    }


def build_adjacency(key):
    # random undirected graph with self loops, row-normalized (mean aggregation)
    a = jax.random.bernoulli(key, 0.05, (NUM_NODES, NUM_NODES)).astype(jnp.float32)
    a = jnp.maximum(a, a.T)
    a = a + jnp.eye(NUM_NODES, dtype=jnp.float32)
    deg = jnp.sum(a, axis=1, keepdims=True)
    return a / deg


if __name__ == "__main__":
    key = jax.random.PRNGKey(0)
    k_params, k_adj = jax.random.split(key)
    params = init_params(k_params)
    a_hat = build_adjacency(k_adj)

    z = cone_forward(params, a_hat, ctxt_idx=1)
    z = jax.block_until_ready(z)

    assert z.shape == (NUM_NODES, DIM) and z.dtype == jnp.float32
    assert bool(jnp.all(jnp.isfinite(z)))

    # bf16 matmul operands vs fp32 reference: generous tolerance on embedding-scale values
    z_ref = cone_reference(params, a_hat, ctxt_idx=1)
    max_err = float(jnp.max(jnp.abs(z - z_ref)))
    assert max_err < 5e-2, f"max abs error vs fp32 reference too large: {max_err}"

    print("KERNEL_OK")
</pallas_src>

<mosaic_0001>
module attributes {stable_mosaic.version = 11 : i64} {
  func.func @_cone_fused_kernel(%arg0: i32, %arg1: memref<1xi32, #tpu.memory_space<smem>>, %arg2: memref<8x128xf32, #tpu.memory_space<vmem>>, %arg3: memref<128x128xf32, #tpu.memory_space<vmem>>, %arg4: memref<1x128xf32, #tpu.memory_space<vmem>>, %arg5: memref<128x128xf32, #tpu.memory_space<vmem>>, %arg6: memref<1x128xf32, #tpu.memory_space<vmem>>, %arg7: memref<256x256xbf16, #tpu.memory_space<vmem>>, %arg8: memref<256x128xbf16, #tpu.memory_space<vmem>>, %arg9: memref<2x128x128xbf16, #tpu.memory_space<vmem>>, %arg10: memref<2x1x128xf32, #tpu.memory_space<vmem>>, %arg11: memref<256x128xf32, #tpu.memory_space<vmem>>) attributes {dimension_semantics = [#tpu.dimension_semantics<arbitrary>], iteration_bounds = array<i64: 1>, scalar_prefetch = 1 : i64, scratch_operands = 0 : i64, tpu.core_type = #tpu.core_type<tc>, window_params = [{pipeline_mode = #tpu.pipeline_mode<synchronous>, transform_indices = @transform_0, window_bounds = array<i64: 8, 128>}, {pipeline_mode = #tpu.pipeline_mode<synchronous>, transform_indices = @transform_1, window_bounds = array<i64: 128, 128>}, {pipeline_mode = #tpu.pipeline_mode<synchronous>, transform_indices = @transform_2, window_bounds = array<i64: 1, 128>}, {pipeline_mode = #tpu.pipeline_mode<synchronous>, transform_indices = @transform_3, window_bounds = array<i64: 128, 128>}, {pipeline_mode = #tpu.pipeline_mode<synchronous>, transform_indices = @transform_4, window_bounds = array<i64: 1, 128>}, {pipeline_mode = #tpu.pipeline_mode<synchronous>, transform_indices = @transform_5, window_bounds = array<i64: 256, 256>}, {pipeline_mode = #tpu.pipeline_mode<synchronous>, transform_indices = @transform_6, window_bounds = array<i64: 256, 128>}, {pipeline_mode = #tpu.pipeline_mode<synchronous>, transform_indices = @transform_7, window_bounds = array<i64: 2, 128, 128>}, {pipeline_mode = #tpu.pipeline_mode<synchronous>, transform_indices = @transform_8, window_bounds = array<i64: 2, 1, 128>}, {pipeline_mode = #tpu.pipeline_mode<synchronous>, transform_indices = @transform_9, window_bounds = array<i64: 256, 128>}]} {
    %c0 = arith.constant 0 : index
    %0 = memref.load %arg1[%c0] : memref<1xi32, #tpu.memory_space<smem>>
    %c0_0 = arith.constant 0 : index
    %c0_1 = arith.constant 0 : index
    %1 = vector.load %arg2[%c0_0, %c0_1] : memref<8x128xf32, #tpu.memory_space<vmem>>, vector<8x128xf32>
    %2 = tpu.iota {dimensions = array<i32: 0>} : vector<8x128xi32>
    %3 = vector.broadcast %0 : i32 to vector<8x128xi32>
    %4 = arith.cmpi eq, %2, %3 : vector<8x128xi32>
    %cst = arith.constant 0.000000e+00 : f32
    %5 = vector.broadcast %cst : f32 to vector<8x128xf32>
    %6 = arith.select %4, %1, %5 : vector<8x128xi1>, vector<8x128xf32>
    %cst_2 = arith.constant dense<0.000000e+00> : vector<128xf32>
    %7 = vector.multi_reduction <add>, %6, %cst_2 [0] : vector<8x128xf32> to vector<128xf32>
    %8 = vector.shape_cast %7 : vector<128xf32> to vector<1x128xf32>
    %c0_3 = arith.constant 0 : index
    %c0_4 = arith.constant 0 : index
    %9 = vector.load %arg3[%c0_3, %c0_4] : memref<128x128xf32, #tpu.memory_space<vmem>>, vector<128x128xf32>
    %cst_5 = arith.constant dense<0.000000e+00> : vector<1x128xf32>
    %10 = tpu.matmul %8, %9, %cst_5 {dimension_numbers = #tpu.dot_dimension_numbers<[1], [0], [0], [1], [0, 0, 1, 1], [], []>} : vector<1x128xf32>, vector<128x128xf32>, vector<1x128xf32> -> vector<1x128xf32>
    %c0_6 = arith.constant 0 : index
    %c0_7 = arith.constant 0 : index
    %11 = vector.load %arg4[%c0_6, %c0_7] : memref<1x128xf32, #tpu.memory_space<vmem>>, vector<1x128xf32>
    %12 = arith.addf %10, %11 : vector<1x128xf32>
    %cst_8 = arith.constant 0.000000e+00 : f32
    %13 = vector.broadcast %cst_8 : f32 to vector<1x128xf32>
    %14 = arith.maximumf %12, %13 : vector<1x128xf32>
    %c0_9 = arith.constant 0 : index
    %c0_10 = arith.constant 0 : index
    %15 = vector.load %arg5[%c0_9, %c0_10] : memref<128x128xf32, #tpu.memory_space<vmem>>, vector<128x128xf32>
    %cst_11 = arith.constant dense<0.000000e+00> : vector<1x128xf32>
    %16 = tpu.matmul %14, %15, %cst_11 {dimension_numbers = #tpu.dot_dimension_numbers<[1], [0], [0], [1], [0, 0, 1, 1], [], []>} : vector<1x128xf32>, vector<128x128xf32>, vector<1x128xf32> -> vector<1x128xf32>
    %c0_12 = arith.constant 0 : index
    %c0_13 = arith.constant 0 : index
    %17 = vector.load %arg6[%c0_12, %c0_13] : memref<1x128xf32, #tpu.memory_space<vmem>>, vector<1x128xf32>
    %18 = arith.addf %16, %17 : vector<1x128xf32>
    %c0_14 = arith.constant 0 : index
    %c0_15 = arith.constant 0 : index
    %19 = vector.load %arg7[%c0_14, %c0_15] : memref<256x256xbf16, #tpu.memory_space<vmem>>, vector<256x256xbf16>
    %c0_16 = arith.constant 0 : index
    %c0_17 = arith.constant 0 : index
    %20 = vector.load %arg8[%c0_16, %c0_17] : memref<256x128xbf16, #tpu.memory_space<vmem>>, vector<256x128xbf16>
    %c0_18 = arith.constant 0 : index
    %c0_19 = arith.constant 0 : index
    %c0_20 = arith.constant 0 : index
    %21 = vector.load %arg10[%c0_18, %c0_19, %c0_20] : memref<2x1x128xf32, #tpu.memory_space<vmem>>, vector<1x1x128xf32>
    %22 = vector.shape_cast %21 : vector<1x1x128xf32> to vector<1x128xf32>
    %23 = arith.addf %22, %18 : vector<1x128xf32>
    %cst_21 = arith.constant dense<0.000000e+00> : vector<256x128xf32>
    %24 = tpu.matmul %19, %20, %cst_21 {dimension_numbers = #tpu.dot_dimension_numbers<[1], [0], [0], [1], [0, 0, 1, 1], [], []>} : vector<256x256xbf16>, vector<256x128xbf16>, vector<256x128xf32> -> vector<256x128xf32>
    %25 = arith.truncf %24 : vector<256x128xf32> to vector<256x128xbf16>
    %c0_22 = arith.constant 0 : index
    %c0_23 = arith.constant 0 : index
    %c0_24 = arith.constant 0 : index
    %26 = vector.load %arg9[%c0_22, %c0_23, %c0_24] : memref<2x128x128xbf16, #tpu.memory_space<vmem>>, vector<1x128x128xbf16>
    %27 = vector.shape_cast %26 : vector<1x128x128xbf16> to vector<128x128xbf16>
    %cst_25 = arith.constant dense<0.000000e+00> : vector<256x128xf32>
    %28 = tpu.matmul %25, %27, %cst_25 {dimension_numbers = #tpu.dot_dimension_numbers<[1], [0], [0], [1], [0, 0, 1, 1], [], []>} : vector<256x128xbf16>, vector<128x128xbf16>, vector<256x128xf32> -> vector<256x128xf32>
    %29 = vector.broadcast %23 : vector<1x128xf32> to vector<256x128xf32>
    %30 = arith.addf %28, %29 : vector<256x128xf32>
    %cst_26 = arith.constant 0.000000e+00 : f32
    %31 = vector.broadcast %cst_26 : f32 to vector<256x128xf32>
    %32 = arith.maximumf %30, %31 : vector<256x128xf32>
    %33 = arith.truncf %32 : vector<256x128xf32> to vector<256x128xbf16>
    %c1 = arith.constant 1 : index
    %c0_27 = arith.constant 0 : index
    %c0_28 = arith.constant 0 : index
    %34 = vector.load %arg10[%c1, %c0_27, %c0_28] : memref<2x1x128xf32, #tpu.memory_space<vmem>>, vector<1x1x128xf32>
    %35 = vector.shape_cast %34 : vector<1x1x128xf32> to vector<1x128xf32>
    %36 = arith.addf %35, %18 : vector<1x128xf32>
    %cst_29 = arith.constant dense<0.000000e+00> : vector<256x128xf32>
    %37 = tpu.matmul %19, %33, %cst_29 {dimension_numbers = #tpu.dot_dimension_numbers<[1], [0], [0], [1], [0, 0, 1, 1], [], []>} : vector<256x256xbf16>, vector<256x128xbf16>, vector<256x128xf32> -> vector<256x128xf32>
    %38 = arith.truncf %37 : vector<256x128xf32> to vector<256x128xbf16>
    %c1_30 = arith.constant 1 : index
    %c0_31 = arith.constant 0 : index
    %c0_32 = arith.constant 0 : index
    %39 = vector.load %arg9[%c1_30, %c0_31, %c0_32] : memref<2x128x128xbf16, #tpu.memory_space<vmem>>, vector<1x128x128xbf16>
    %40 = vector.shape_cast %39 : vector<1x128x128xbf16> to vector<128x128xbf16>
    %cst_33 = arith.constant dense<0.000000e+00> : vector<256x128xf32>
    %41 = tpu.matmul %38, %40, %cst_33 {dimension_numbers = #tpu.dot_dimension_numbers<[1], [0], [0], [1], [0, 0, 1, 1], [], []>} : vector<256x128xbf16>, vector<128x128xbf16>, vector<256x128xf32> -> vector<256x128xf32>
    %42 = vector.broadcast %36 : vector<1x128xf32> to vector<256x128xf32>
    %43 = arith.addf %41, %42 : vector<256x128xf32>
    %c0_34 = arith.constant 0 : index
    %c0_35 = arith.constant 0 : index
    %44 = vector.load %arg11[%c0_34, %c0_35] : memref<256x128xf32, #tpu.memory_space<vmem>>, vector<256x128xf32>
    tpu.vector_store %arg11[%c0_34, %c0_35], %43 {strides = array<i32>} : memref<256x128xf32, #tpu.memory_space<vmem>>, vector<256x128xf32>,
    return
  }
  func.func @transform_0(%arg0: i32, %arg1: memref<1xi32, #tpu.memory_space<smem>>) -> (i32, i32) {
    %c0_i32 = arith.constant 0 : i32
    %c0_i32_0 = arith.constant 0 : i32
    %c0_i32_1 = arith.constant 0 : i32
    return %c0_i32, %c0_i32_0 : i32, i32
  }
  func.func @transform_1(%arg0: i32, %arg1: memref<1xi32, #tpu.memory_space<smem>>) -> (i32, i32) {
    %c0_i32 = arith.constant 0 : i32
    %c0_i32_0 = arith.constant 0 : i32
    %c0_i32_1 = arith.constant 0 : i32
    return %c0_i32, %c0_i32_0 : i32, i32
  }
  func.func @transform_2(%arg0: i32, %arg1: memref<1xi32, #tpu.memory_space<smem>>) -> (i32, i32) {
    %c0_i32 = arith.constant 0 : i32
    %c0_i32_0 = arith.constant 0 : i32
    %c0_i32_1 = arith.constant 0 : i32
    return %c0_i32, %c0_i32_0 : i32, i32
  }
  func.func @transform_3(%arg0: i32, %arg1: memref<1xi32, #tpu.memory_space<smem>>) -> (i32, i32) {
    %c0_i32 = arith.constant 0 : i32
    %c0_i32_0 = arith.constant 0 : i32
    %c0_i32_1 = arith.constant 0 : i32
    return %c0_i32, %c0_i32_0 : i32, i32
  }
  func.func @transform_4(%arg0: i32, %arg1: memref<1xi32, #tpu.memory_space<smem>>) -> (i32, i32) {
    %c0_i32 = arith.constant 0 : i32
    %c0_i32_0 = arith.constant 0 : i32
    %c0_i32_1 = arith.constant 0 : i32
    return %c0_i32, %c0_i32_0 : i32, i32
  }
  func.func @transform_5(%arg0: i32, %arg1: memref<1xi32, #tpu.memory_space<smem>>) -> (i32, i32) {
    %c0_i32 = arith.constant 0 : i32
    %c0_i32_0 = arith.constant 0 : i32
    %c0_i32_1 = arith.constant 0 : i32
    return %c0_i32, %c0_i32_0 : i32, i32
  }
  func.func @transform_6(%arg0: i32, %arg1: memref<1xi32, #tpu.memory_space<smem>>) -> (i32, i32) {
    %c0_i32 = arith.constant 0 : i32
    %c0_i32_0 = arith.constant 0 : i32
    %c0_i32_1 = arith.constant 0 : i32
    return %c0_i32, %c0_i32_0 : i32, i32
  }
  func.func @transform_7(%arg0: i32, %arg1: memref<1xi32, #tpu.memory_space<smem>>) -> (i32, i32, i32) {
    %c0_i32 = arith.constant 0 : i32
    %c0_i32_0 = arith.constant 0 : i32
    %c0_i32_1 = arith.constant 0 : i32
    %c0_i32_2 = arith.constant 0 : i32
    return %c0_i32, %c0_i32_0, %c0_i32_1 : i32, i32, i32
  }
  func.func @transform_8(%arg0: i32, %arg1: memref<1xi32, #tpu.memory_space<smem>>) -> (i32, i32, i32) {
    %c0_i32 = arith.constant 0 : i32
    %c0_i32_0 = arith.constant 0 : i32
    %c0_i32_1 = arith.constant 0 : i32
    %c0_i32_2 = arith.constant 0 : i32
    return %c0_i32, %c0_i32_0, %c0_i32_1 : i32, i32, i32
  }
  func.func @transform_9(%arg0: i32, %arg1: memref<1xi32, #tpu.memory_space<smem>>) -> (i32, i32) {
    %c0_i32 = arith.constant 0 : i32
    %c0_i32_0 = arith.constant 0 : i32
    %c0_i32_1 = arith.constant 0 : i32
    return %c0_i32, %c0_i32_0 : i32, i32
  }
}

</mosaic_0001>

<bundles_post_ra>
// kernel: tpu_custom_call.1
= control target key start
LH: loop header
LB: loop body
LE: loop exit
PB: predicated region body
PF: predicated region fallthrough
CT: control target
= control target key end

     0   :  { %16 = vsyncpa [#allocation5], 0  ;;  %s2800_s0 = inlined_call_operand.<no memory space> [shape: s32[1], index: 0, kind: input, shape index: {}]   ;;  %s2801_s1 = inlined_call_operand.hbm [shape: f32[8,128], index: 1, kind: input, shape index: {}]   ;;  %s2802_s2 = inlined_call_operand.hbm [shape: f32[128,128], index: 2, kind: input, shape index: {}]   ;;  %s2803_s3 = inlined_call_operand.vmem [shape: f32[1,128], index: 3, kind: input, shape index: {}]   ;;  %s2804_s4 = inlined_call_operand.hbm [shape: f32[128,128], index: 4, kind: input, shape index: {}]   ;;  %s2805_s5 = inlined_call_operand.vmem [shape: f32[1,128], index: 5, kind: input, shape index: {}]   ;;  %s2806_s6 = inlined_call_operand.hbm [shape: bf16[256,256], index: 6, kind: input, shape index: {}]   ;;  %s2807_s7 = inlined_call_operand.hbm [shape: bf16[256,128], index: 7, kind: input, shape index: {}]   ;;  %s2808_s8 = inlined_call_operand.hbm [shape: bf16[2,128,128], index: 8, kind: input, shape index: {}]   ;;  %s2809_s9 = inlined_call_operand.vmem [shape: f32[2,1,128], index: 9, kind: input, shape index: {}]   ;;  %s2810_s10 = inlined_call_operand.hbm [shape: f32[256,128], index: 10, kind: output, shape index: {}]  }
   0x1   :  { %17 = vsyncpa [#allocation8], 0 }
   0x2   :  { %18 = vsyncpa [#allocation11], 0 }
   0x3   :  { %19 = vsyncpa [#allocation14], 0 }
   0x4   :  { %20 = vsyncpa [#allocation6], 0  ;;  %s2389_s13 = smov [#allocation7]   ;;  %s2225_s17 = scalar_lea.hbm %s2802_s2, 2048 }
   0x5   :  { %s36_s14 = sshll.u32 %s2389_s13, 4  ;;  %p2226_p0 = scmp.ne.s32.totalorder %s2802_s2, %s2225_s17  ;;  %s37_s14 = int_to_ptr.vmem [resolvable:$true] %s36_s14 }
   0x6   :  { %p2229_p1 = scmp.lt.u32.totalorder %s2225_s17, %s2802_s2 }
   0x8   :  { %p2231_p2 = pnand %p2229_p1, %p2226_p0 }
   0xa   :  { %2234 = shalt.err (!%p2231_p2)
}
   0xb   :  { %s2235_s22 = scalar_lea.vmem %s37_s14, 2048  ;;  %p2240_p4 = scmp.lt.s32.totalorder %s37_s14, %s37_s14 }
   0xc   :  { %p2236_p3 = scmp.ne.s32.totalorder %s37_s14, %s2235_s22  ;;  %p2241_p5 = scmp.lt.s32.totalorder %s2235_s22, %s2235_s22 }
   0xe   :  { %p2242_p6 = por %p2241_p5, %p2240_p4 }
  0x10   :  { %p2243_p7 = pnand %p2242_p6, %p2236_p3 }
  0x12   :  { %2246 = shalt.err (!%p2243_p7)
}
  0x13   :  { %s2390_s23 = smov 128   ;;  %s2391_s24 = smov 8  }
  0x14   :  { %42 = dma.hbm_to_vmem [thread:$0]  %s2802_s2, 2048, %s37_s14, [#allocation8], %s2390_s23, %s2390_s23, %s2391_s24  }
  0x15   :  { %s2392_s27 = smov [#allocation10]   ;;  %s2393_s29 = smov [#allocation4]  }
  0x16   :  { %s64_s28 = sshll.u32 %s2392_s27, 4  ;;  %s27_s30 = sshll.u32 %s2393_s29, 4  ;;  %s65_s28 = int_to_ptr.vmem [resolvable:$true] %s64_s28  ;;  %s28_s30 = int_to_ptr.vmem [resolvable:$true] %s27_s30 }
  0x17   :  { %s2247_s13 = scalar_lea.hbm %s2806_s6, 4096 }
  0x18   :  { %p2248_p8 = scmp.ne.s32.totalorder %s2806_s6, %s2247_s13  ;;  %p2251_p9 = scmp.lt.u32.totalorder %s2247_s13, %s2806_s6 }
  0x1a   :  { %p2253_p10 = pnand %p2251_p9, %p2248_p8 }
  0x1c   :  { %2256 = shalt.err (!%p2253_p10)
}
  0x1d   :  { %s2257_s2 = scalar_lea.vmem %s65_s28, 4096  ;;  %p2262_p12 = scmp.lt.s32.totalorder %s65_s28, %s65_s28 }
  0x1e   :  { %p2258_p11 = scmp.ne.s32.totalorder %s65_s28, %s2257_s2  ;;  %p2263_p13 = scmp.lt.s32.totalorder %s2257_s2, %s2257_s2 }
  0x20   :  { %p2264_p0 = por %p2263_p13, %p2262_p12 }
  0x22   :  { %p2265_p1 = pnand %p2264_p0, %p2258_p11 }
  0x24   :  { %2268 = shalt.err (!%p2265_p1)
}
  0x25   :  { %70 = dma.hbm_to_vmem [thread:$0]  %s2806_s6, 4096, %s65_s28, [#allocation11], %s2390_s23, %s2390_s23, %s2391_s24  }
  0x26   :  { %s2269_s22 = scalar_lea.hbm %s2801_s1, 128 }
  0x27   :  { %p2270_p2 = scmp.ne.s32.totalorder %s2801_s1, %s2269_s22  ;;  %p2273_p3 = scmp.lt.u32.totalorder %s2269_s22, %s2801_s1 }
  0x29   :  { %p2275_p4 = pnand %p2273_p3, %p2270_p2 }
  0x2b   :  { %2278 = shalt.err (!%p2275_p4)
}
  0x2c   :  { %s2279_s11 = scalar_lea.vmem %s28_s30, 128  ;;  %p2284_p6 = scmp.lt.s32.totalorder %s28_s30, %s28_s30 }
  0x2d   :  { %p2280_p5 = scmp.ne.s32.totalorder %s28_s30, %s2279_s11  ;;  %p2285_p7 = scmp.lt.s32.totalorder %s2279_s11, %s2279_s11 }
  0x2f   :  { %p2286_p8 = por %p2285_p7, %p2284_p6 }
  0x31   :  { %p2287_p9 = pnand %p2286_p8, %p2280_p5 }
  0x33   :  { %2290 = shalt.err (!%p2287_p9)
}
  0x34   :  { %30 = dma.hbm_to_vmem [thread:$0]  %s2801_s1, 128, %s28_s30, [#allocation5]  }
  0x35   :  { %s2394_s12 = smov [#allocation9]   ;;  %s2395_s15 = smov [#allocation12]  }
  0x36   :  { %s50_s13 = sshll.u32 %s2394_s12, 4  ;;  %s76_s16 = sshll.u32 %s2395_s15, 4  ;;  %s51_s13 = int_to_ptr.vmem [resolvable:$true] %s50_s13  ;;  %s77_s16 = int_to_ptr.vmem [resolvable:$true] %s76_s16 }
  0x37   :  { %s2291_s2 = scalar_lea.hbm %s2804_s4, 2048 }
  0x38   :  { %p2292_p10 = scmp.ne.s32.totalorder %s2804_s4, %s2291_s2  ;;  %p2295_p11 = scmp.lt.u32.totalorder %s2291_s2, %s2804_s4 }
  0x3a   :  { %p2297_p12 = pnand %p2295_p11, %p2292_p10 }
  0x3c   :  { %2300 = shalt.err (!%p2297_p12)
}
  0x3d   :  { %s2301_s1 = scalar_lea.vmem %s51_s13, 2048  ;;  %p2306_p0 = scmp.lt.s32.totalorder %s51_s13, %s51_s13 }
  0x3e   :  { %p2302_p13 = scmp.ne.s32.totalorder %s51_s13, %s2301_s1  ;;  %p2307_p1 = scmp.lt.s32.totalorder %s2301_s1, %s2301_s1 }
  0x40   :  { %p2308_p2 = por %p2307_p1, %p2306_p0 }
  0x42   :  { %p2309_p3 = pnand %p2308_p2, %p2302_p13 }
  0x44   :  { %2312 = shalt.err (!%p2309_p3)
}
  0x45   :  { %56 = dma.hbm_to_vmem [thread:$0]  %s2804_s4, 2048, %s51_s13, [#allocation8], %s2390_s23, %s2390_s23, %s2391_s24  }
  0x46   :  { %s2313_s27 = scalar_lea.hbm %s2807_s7, 2048 }
  0x47   :  { %p2314_p4 = scmp.ne.s32.totalorder %s2807_s7, %s2313_s27  ;;  %p2317_p5 = scmp.lt.u32.totalorder %s2313_s27, %s2807_s7 }
  0x49   :  { %p2319_p6 = pnand %p2317_p5, %p2314_p4 }
  0x4b   :  { %2322 = shalt.err (!%p2319_p6)
}
  0x4c   :  { %s2323_s12 = scalar_lea.vmem %s77_s16, 2048  ;;  %p2328_p8 = scmp.lt.s32.totalorder %s77_s16, %s77_s16 }
  0x4d   :  { %p2324_p7 = scmp.ne.s32.totalorder %s77_s16, %s2323_s12  ;;  %p2329_p9 = scmp.lt.s32.totalorder %s2323_s12, %s2323_s12 }
  0x4f   :  { %p2330_p10 = por %p2329_p9, %p2328_p8 }
  0x51   :  { %p2331_p11 = pnand %p2330_p10, %p2324_p7 }
  0x53   :  { %2334 = shalt.err (!%p2331_p11)
}
  0x54   :  { %s2396_s4 = smov 64   ;;  %s2397_s13 = smov 4  }
  0x55   :  { %82 = dma.hbm_to_vmem [thread:$0]  %s2807_s7, 2048, %s77_s16, [#allocation11], %s2396_s4, %s2396_s4, %s2397_s13  }
  0x56   :  { %s2398_s18 = smov [#allocation13]   ;;  %s2335_s20 = scalar_lea.hbm %s2808_s8, 2048 }
  0x57   :  { %s88_s2 = sshll.u32 %s2398_s18, 4  ;;  %p2336_p12 = scmp.ne.s32.totalorder %s2808_s8, %s2335_s20  ;;  %s89_s2 = int_to_ptr.vmem [resolvable:$true] %s88_s2 }
  0x58   :  { %p2339_p13 = scmp.lt.u32.totalorder %s2335_s20, %s2808_s8 }
  0x5a   :  { %p2341_p0 = pnand %p2339_p13, %p2336_p12 }
  0x5c   :  { %2344 = shalt.err (!%p2341_p0)
}
  0x5d   :  { %s2345_s25 = scalar_lea.vmem %s89_s2, 2048  ;;  %p2350_p2 = scmp.lt.s32.totalorder %s89_s2, %s89_s2 }
  0x5e   :  { %p2346_p1 = scmp.ne.s32.totalorder %s89_s2, %s2345_s25  ;;  %p2351_p3 = scmp.lt.s32.totalorder %s2345_s25, %s2345_s25 }
  0x60   :  { %p2352_p4 = por %p2351_p3, %p2350_p2 }
  0x62   :  { %p2353_p5 = pnand %p2352_p4, %p2346_p1 }
  0x64   :  { %2356 = shalt.err (!%p2353_p5)
}
  0x65   :  { %94 = dma.hbm_to_vmem [thread:$0]  %s2808_s8, 2048, %s89_s2, [#allocation14], %s2396_s4, %s2396_s4, %s2397_s13  }
  0x66   :  { %2379 = dma.done.wait [#allocation5], 128  }
  0x67   :  { %2380 = vsyncadd [#allocation5], 4294967168 }
  0x68   :  { %2381 = dma.done.wait [#allocation8], 4096  }
  0x69   :  { %2382 = vsyncadd [#allocation8], 4294963200 }
  0x6a   :  { %2383 = dma.done.wait [#allocation11], 6144  }
  0x6b   :  { %2384 = vsyncadd [#allocation11], 4294961152 }
  0x6c   :  { %2385 = dma.done.wait [#allocation14], 2048  }
  0x6d   :  { %2386 = vsyncadd [#allocation14], 4294965248  ;;  %v2399_v0 = vmov 0.0|0.0   ;;  %vm2400_vm0 = vmmov 0   ;;  %v2401_v1 = vmov 0.0   ;;  %v118_v2 = vlaneseq  ;;  %v129_v3 = vld [vmem:[#allocation7] sm:$0xff] }
  0x6e   :  { %2083 = vmatprep.subr.bf16.mxu0 %v2399_v0  ;;  %1949 = vmatprep.mubr.msk.f32.mxu0 %vm2400_vm0, %v2401_v1  ;;  %v130_v4 = vld [vmem:[#allocation7 + $0x8] sm:$0xff]  ;;  %v131_v5 = vld [vmem:[#allocation7 + $0x10] sm:$0xff]  ;;  %v132_v8 = vld [vmem:[#allocation7 + $0x18] sm:$0xff]  ;;  %v120_v9 = vstv %s2800_s0 }
  0x6f   :  { %2107 = vmatprep.subr.bf16.mxu1 %v2399_v0  ;;  %1984 = vmatprep.mubr.msk.f32.mxu1 %vm2400_vm0, %v2401_v1  ;;  %v2541_v6 = vshrl.u32 %v118_v2, 7  ;;  %v2084_v7 = vpack.c.bf16 %v130_v4, %v129_v3  ;;  %v2087_v10 = vpack.c.bf16 %v132_v8, %v131_v5  ;;  %v133_v11 = vld [vmem:[#allocation7 + $0x20] sm:$0xff]  ;;  %v134_v12 = vld [vmem:[#allocation7 + $0x28] sm:$0xff]  ;;  %v117_v13 = vld [vmem:[#allocation4] sm:$0xff] }
  0x70   :  { %v2090_v14 = vpack.c.bf16 %v134_v12, %v133_v11  ;;  %v135_v15 = vld [vmem:[#allocation7 + $0x30] sm:$0xff]  ;;  %v136_v17 = vld [vmem:[#allocation7 + $0x38] sm:$0xff]  ;;  %v137_v20 = vld [vmem:[#allocation7 + $0x40] sm:$0xff] }
  0x71   :  { %2085 = vmatpush3.bf16.msra.mxu0 %v2084_v7  ;;  %vm121_vm1 = vcmp.eq.s32.totalorder %v2541_v6, %v120_v9  ;;  %v2093_v19 = vpack.c.bf16 %v136_v17, %v135_v15  ;;  %v138_v21 = vld [vmem:[#allocation7 + $0x48] sm:$0xff]  ;;  %v139_v24 = vld [vmem:[#allocation7 + $0x50] sm:$0xff]  ;;  %v140_v25 = vld [vmem:[#allocation7 + $0x58] sm:$0xff] }
  0x72   :  { %2086 = vmatprep.subr.bf16.mxu0 %v2399_v0  ;;  %v122_v16 = vsel %vm121_vm1, %v117_v13, 0.0  ;;  %v2096_v23 = vpack.c.bf16 %v138_v21, %v137_v20  ;;  %v2099_v27 = vpack.c.bf16 %v140_v25, %v139_v24  ;;  %v141_v28 = vld [vmem:[#allocation7 + $0x60] sm:$0xff]  ;;  %v142_v29 = vld [vmem:[#allocation7 + $0x68] sm:$0xff]  ;;  %v143_v32 = vld [vmem:[#allocation7 + $0x70] sm:$0xff] }
  0x73   :  { %v123_v18 = vrot.slane %v122_v16, 4  ;;  %v2102_v31 = vpack.c.bf16 %v142_v29, %v141_v28  ;;  %v144_v33 = vld [vmem:[#allocation7 + $0x78] sm:$0xff]  ;;  %v2145_v36 = vld [vmem:[#allocation12 + $0x40] sm:$0xff]   ;;  %v2147_v40 = vld [vmem:[#allocation12 + $0x48] sm:$0xff]  }
  0x74   :  { %v2105_v35 = vpack.c.bf16 %v144_v33, %v143_v32  ;;  %v2146_v38 = vld [vmem:[#allocation12] sm:$0xff]   ;;  %v2148_v41 = vld [vmem:[#allocation12 + $0x8] sm:$0xff]   ;;  %v2149_v42 = vld [vmem:[#allocation12 + $0x50] sm:$0xff]  }
  0x75   :  { %2088 = vmatpush3.bf16.msra.mxu0 %v2087_v10  ;;  %v124_v22 = vadd.f32 %v123_v18, %v122_v16  ;;  %v2554_v39 = vld [vmem:[#allocation10 + $0x4] ss:$8 sps:$4 sm:$0xff]   ;;  %v2150_v43 = vld [vmem:[#allocation12 + $0x10] sm:$0xff]   ;;  %v2151_v44 = vld [vmem:[#allocation12 + $0x58] sm:$0xff]  }
  0x76   :  { %2089 = vmatprep.subr.bf16.mxu0 %v2399_v0  ;;  %v2152_v45 = vld [vmem:[#allocation12 + $0x18] sm:$0xff]   ;;  %v2153_v46 = vld [vmem:[#allocation12 + $0x60] sm:$0xff]   ;;  %v2155_v48 = vld [vmem:[#allocation12 + $0x68] sm:$0xff]  }
  0x77   :  { %v125_v26 = vrot.slane %v124_v22, 2  ;;  %v2154_v47 = vld [vmem:[#allocation12 + $0x20] sm:$0xff]   ;;  %v2156_v49 = vld [vmem:[#allocation12 + $0x28] sm:$0xff]   ;;  %v2157_v50 = vld [vmem:[#allocation12 + $0x70] sm:$0xff]  }
  0x78   :  { %v2158_v51 = vld [vmem:[#allocation12 + $0x30] sm:$0xff]   ;;  %v2159_v52 = vld [vmem:[#allocation12 + $0x78] sm:$0xff]   ;;  %v217_v53 = vld [vmem:[#allocation9] sm:$0xff] }
  0x79   :  { %2091 = vmatpush3.bf16.msra.mxu0 %v2090_v14  ;;  %v126_v30 = vadd.f32 %v125_v26, %v124_v22  ;;  %v218_v54 = vld [vmem:[#allocation9 + $0x8] sm:$0xff]  ;;  %v219_v55 = vld [vmem:[#allocation9 + $0x10] sm:$0xff]  ;;  %v2160_v56 = vld [vmem:[#allocation12 + $0x38] sm:$0xff]  }
  0x7a   :  { %2092 = vmatprep.subr.bf16.mxu0 %v2399_v0  ;;  %v2108_v57 = vpack.c.bf16 %v218_v54, %v217_v53  ;;  %v220_v58 = vld [vmem:[#allocation9 + $0x18] sm:$0xff]  ;;  %v2557_v60 = vld [vmem:[#allocation10] ss:$8 sps:$4 sm:$0xff]   ;;  %v223_v2 = vld [vmem:[#allocation9 + $0x30] sm:$0xff] }
  0x7b   :  { %v127_v34 = vrot.slane %v126_v30, 1  ;;  %v2111_v59 = vpack.c.bf16 %v220_v58, %v219_v55  ;;  %v221_v61 = vld [vmem:[#allocation9 + $0x20] sm:$0xff]  ;;  %v222_v62 = vld [vmem:[#allocation9 + $0x28] sm:$0xff]  ;;  %v2560_v63 = vld [vmem:[#allocation10 + $0x14] ss:$8 sps:$4 sm:$0xff]  }
  0x7c   :  { %2109 = vmatpush3.bf16.msra.mxu1 %v2108_v57  ;;  %v2114_v1 = vpack.c.bf16 %v222_v62, %v221_v61  ;;  %v224_v3 = vld [vmem:[#allocation9 + $0x38] sm:$0xff]  ;;  %v225_v7 = vld [vmem:[#allocation9 + $0x40] sm:$0xff]  ;;  %v226_v8 = vld [vmem:[#allocation9 + $0x48] sm:$0xff] }
  0x7d   :  { %2094 = vmatpush3.bf16.msra.mxu0 %v2093_v19  ;;  %v128_v37 = vadd.f32 %v127_v34, %v126_v30  ;;  %2110 = vmatprep.subr.bf16.mxu1 %v2399_v0  ;;  %v2117_v4 = vpack.c.bf16 %v224_v3, %v223_v2  ;;  %v2565_v5 = vld [vmem:[#allocation10 + $0x10] ss:$8 sps:$4 sm:$0xff]   ;;  %v2568_v9 = vld [vmem:[#allocation10 + $0x24] ss:$8 sps:$4 sm:$0xff]   ;;  %v2120_v10 = vpack.c.bf16 %v226_v8, %v225_v7  ;;  %v2573_v14 = vld [vmem:[#allocation10 + $0x20] ss:$8 sps:$4 sm:$0xff]  }
  0x7e   :  { %2095 = vmatprep.subr.bf16.mxu0 %v2399_v0  ;;  %v227_v11 = vld [vmem:[#allocation9 + $0x50] sm:$0xff]  ;;  %v228_v12 = vld [vmem:[#allocation9 + $0x58] sm:$0xff]  ;;  %v229_v15 = vld [vmem:[#allocation9 + $0x60] sm:$0xff] }
  0x7f   :  { %v2123_v13 = vpack.c.bf16 %v228_v12, %v227_v11  ;;  %v230_v16 = vld [vmem:[#allocation9 + $0x68] sm:$0xff]  ;;  %v2576_v17 = vld [vmem:[#allocation10 + $0x34] ss:$8 sps:$4 sm:$0xff]   ;;  %v2581_v19 = vld [vmem:[#allocation10 + $0x30] ss:$8 sps:$4 sm:$0xff]  }
  0x80   :  { %2112 = vmatpush3.bf16.msra.mxu1 %v2111_v59  ;;  %v2126_v18 = vpack.c.bf16 %v230_v16, %v229_v15  ;;  %v2584_v20 = vld [vmem:[#allocation10 + $0x44] ss:$8 sps:$4 sm:$0xff]   ;;  %v2588_v21 = vld [vmem:[#allocation10 + $0x40] ss:$8 sps:$4 sm:$0xff]   ;;  %v2590_v22 = vld [vmem:[#allocation10 + $0x54] ss:$8 sps:$4 sm:$0xff]  }
  0x81   :  { %2097 = vmatpush3.bf16.msra.mxu0 %v2096_v23  ;;  %2113 = vmatprep.subr.bf16.mxu1 %v2399_v0  ;;  %v2594_v23 = vld [vmem:[#allocation10 + $0x50] ss:$8 sps:$4 sm:$0xff]   ;;  %v2596_v24 = vld [vmem:[#allocation10 + $0x64] ss:$8 sps:$4 sm:$0xff]   ;;  %v2602_v25 = vld [vmem:[#allocation10 + $0x74] ss:$8 sps:$4 sm:$0xff]  }
  0x82   :  { %2098 = vmatprep.subr.bf16.mxu0 %v2399_v0  ;;  %v231_v26 = vld [vmem:[#allocation9 + $0x70] sm:$0xff]  ;;  %v2608_v30 = vld [vmem:[#allocation10 + $0x84] ss:$8 sps:$4 sm:$0xff]   ;;  %v2612_v32 = vld [vmem:[#allocation10 + $0x80] ss:$8 sps:$4 sm:$0xff]  }
  0x83   :  { %v2606_v29 = vld [vmem:[#allocation10 + $0x70] ss:$8 sps:$4 sm:$0xff]   ;;  %v2614_v33 = vld [vmem:[#allocation10 + $0x94] ss:$8 sps:$4 sm:$0xff]   ;;  %v2210_v53 = vld [vmem:[#allocation13 + $0x8] sm:$0xff]  }
  0x84   :  { %2115 = vmatpush3.bf16.msra.mxu1 %v2114_v1  ;;  %v2618_v34 = vld [vmem:[#allocation10 + $0x90] ss:$8 sps:$4 sm:$0xff]   ;;  %v2214_v57 = vld [vmem:[#allocation13 + $0x28] sm:$0xff]  }
  0x85   :  { %2100 = vmatpush3.bf16.msra.mxu0 %v2099_v27  ;;  %2116 = vmatprep.subr.bf16.mxu1 %v2399_v0  ;;  %v232_v27 = vld [vmem:[#allocation9 + $0x78] sm:$0xff]  ;;  %v2211_v54 = vld [vmem:[#allocation13 + $0x10] sm:$0xff]  }
  0x86   :  { %2101 = vmatprep.subr.bf16.mxu0 %v2399_v0  ;;  %v2129_v28 = vpack.c.bf16 %v232_v27, %v231_v26  ;;  %v2212_v55 = vld [vmem:[#allocation13 + $0x18] sm:$0xff]   ;;  %v2215_v58 = vld [vmem:[#allocation13 + $0x30] sm:$0xff]  }
  0x87   :  { %v2216_v59 = vld [vmem:[#allocation13 + $0x38] sm:$0xff]  }
  0x88   :  { %2118 = vmatpush3.bf16.msra.mxu1 %v2117_v4 }
  0x89   :  { %2103 = vmatpush3.bf16.msra.mxu0 %v2102_v31  ;;  %2119 = vmatprep.subr.bf16.mxu1 %v2399_v0  ;;  %v2209_v31 = vld [vmem:[#allocation13] sm:$0xff]  }
  0x8a   :  { %2104 = vmatprep.subr.bf16.mxu0 %v2399_v0 }
  0x8c   :  { %2121 = vmatpush3.bf16.msra.mxu1 %v2120_v10 }
  0x8d   :  { %2106 = vmatpush3.bf16.msra.mxu0 %v2105_v35  ;;  %2122 = vmatprep.subr.bf16.mxu1 %v2399_v0  ;;  %v2620_v35 = vld [vmem:[#allocation10 + $0xa4] ss:$8 sps:$4 sm:$0xff]  }
  0x8e   :  { %1645 = vmatprep.subr.bf16.mxu0 %v2145_v36  ;;  %v2624_v36 = vld [vmem:[#allocation10 + $0xa0] ss:$8 sps:$4 sm:$0xff]  }
  0x90   :  { %1950 = vmatmul.mubr.f32.vlgmr.msra.gmra.mrb[0].mxu0 %v128_v37  ;;  %2124 = vmatpush3.bf16.msra.mxu1 %v2123_v13  ;;  %v2626_v37 = vld [vmem:[#allocation10 + $0xb4] ss:$8 sps:$4 sm:$0xff]  }
  0x91   :  { %1646 = vmatpush3.bf16.msra.mxu0 %v2146_v38  ;;  %658 = vmatprep.mubr.bf16.mxu0 %v2554_v39  ;;  %v2630_v38 = vld [vmem:[#allocation10 + $0xb0] ss:$8 sps:$4 sm:$0xff]  }
  0x92   :  { %1647 = vmatprep.subr.bf16.mxu0 %v2147_v40  ;;  %2125 = vmatprep.subr.bf16.mxu1 %v2399_v0  ;;  %v2632_v40 = vld [vmem:[#allocation10 + $0xc4] ss:$8 sps:$4 sm:$0xff]  }
  0x94   :  { %2127 = vmatpush3.bf16.msra.mxu1 %v2126_v18 }
  0x95   :  { %1648 = vmatpush3.bf16.msra.mxu0 %v2148_v41  ;;  %2128 = vmatprep.subr.bf16.mxu1 %v2399_v0  ;;  %v2600_v0 = vld [vmem:[#allocation10 + $0x60] ss:$8 sps:$4 sm:$0xff]  }
  0x96   :  { %1649 = vmatprep.subr.bf16.mxu0 %v2149_v42  ;;  %v2636_v41 = vld [vmem:[#allocation10 + $0xc0] ss:$8 sps:$4 sm:$0xff]   ;;  %v2638_v42 = vld [vmem:[#allocation10 + $0xd4] ss:$8 sps:$4 sm:$0xff]  }
  0x98   :  { %2130 = vmatpush3.bf16.msra.mxu1 %v2129_v28 }
  0x99   :  { %1650 = vmatpush3.bf16.msra.mxu0 %v2150_v43  ;;  %1987 = vmatprep.subr.bf16.mxu1 %v2209_v31  ;;  %v2642_v43 = vld [vmem:[#allocation10 + $0xd0] ss:$8 sps:$4 sm:$0xff]  }
  0x9a   :  { %1651 = vmatprep.subr.bf16.mxu0 %v2151_v44  ;;  %v2644_v44 = vld [vmem:[#allocation10 + $0xe4] ss:$8 sps:$4 sm:$0xff]  }
  0x9d   :  { %1652 = vmatpush3.bf16.msra.mxu0 %v2152_v45  ;;  %v2648_v45 = vld [vmem:[#allocation10 + $0xe0] ss:$8 sps:$4 sm:$0xff]  }
  0x9e   :  { %1653 = vmatprep.subr.bf16.mxu0 %v2153_v46  ;;  %v2650_v46 = vld [vmem:[#allocation10 + $0xf4] ss:$8 sps:$4 sm:$0xff]  }
  0xa1   :  { %1654 = vmatpush3.bf16.msra.mxu0 %v2154_v47  ;;  %v2654_v47 = vld [vmem:[#allocation10 + $0xf0] ss:$8 sps:$4 sm:$0xff]  }
  0xa2   :  { %1655 = vmatprep.subr.bf16.mxu0 %v2155_v48  ;;  %v145_v48 = vld [vmem:[%s2803_s3] sm:$0x1] }
  0xa5   :  { %1656 = vmatpush3.bf16.msra.mxu0 %v2156_v49 }
  0xa6   :  { %1657 = vmatprep.subr.bf16.mxu0 %v2157_v50 }
  0xa9   :  { %1658 = vmatpush3.bf16.msra.mxu0 %v2158_v51 }
  0xaa   :  { %1659 = vmatprep.subr.bf16.mxu0 %v2159_v52 }
  0xad   :  { %1660 = vmatpush3.bf16.msra.mxu0 %v2160_v56  ;;  %v2213_v56 = vld [vmem:[#allocation13 + $0x20] sm:$0xff]  }
  0xb0   :  { %659 = vmatmul.mubr.bf16.vlgmr.msra.gmra.mrb[4].mxu0 %v2557_v60 }
  0xb1   :  { %666 = vmatprep.mubr.bf16.mxu0 %v2560_v63 }
  0xb8   :  { %667 = vmatmul.mubr.bf16.gmra.mrb[8].mxu0 %v2565_v5 }
  0xb9   :  { %674 = vmatprep.mubr.bf16.mxu0 %v2568_v9 }
  0xc0   :  { %675 = vmatmul.mubr.bf16.gmra.mrb[12].mxu0 %v2573_v14 }
  0xc1   :  { %682 = vmatprep.mubr.bf16.mxu0 %v2576_v17 }
  0xc8   :  { %683 = vmatmul.mubr.bf16.gmra.mrb[16].mxu0 %v2581_v19 }
  0xc9   :  { %690 = vmatprep.mubr.bf16.mxu0 %v2584_v20 }
  0xd0   :  { %691 = vmatmul.mubr.bf16.gmra.mrb[20].mxu0 %v2588_v21 }
  0xd1   :  { %698 = vmatprep.mubr.bf16.mxu0 %v2590_v22 }
  0xd8   :  { %699 = vmatmul.mubr.bf16.gmra.mrb[24].mxu0 %v2594_v23 }
  0xd9   :  { %706 = vmatprep.mubr.bf16.mxu0 %v2596_v24 }
  0xe0   :  { %707 = vmatmul.mubr.bf16.gmra.mrb[28].mxu0 %v2600_v0 }
  0xe1   :  { %714 = vmatprep.mubr.bf16.mxu0 %v2602_v25 }
  0xe8   :  { %715 = vmatmul.mubr.bf16.gmra.mrb[32].mxu0 %v2606_v29 }
  0xe9   :  { %722 = vmatprep.mubr.bf16.mxu0 %v2608_v30 }
  0xf0   :  { %723 = vmatmul.mubr.bf16.gmra.mrb[36].mxu0 %v2612_v32 }
  0xf1   :  { %730 = vmatprep.mubr.bf16.mxu0 %v2614_v33 }
  0xf8   :  { %731 = vmatmul.mubr.bf16.gmra.mrb[40].mxu0 %v2618_v34 }
  0xf9   :  { %738 = vmatprep.mubr.bf16.mxu0 %v2620_v35 }
 0x100   :  { %739 = vmatmul.mubr.bf16.gmra.mrb[44].mxu0 %v2624_v36 }
 0x101   :  { %746 = vmatprep.mubr.bf16.mxu0 %v2626_v37 }
 0x108   :  { %747 = vmatmul.mubr.bf16.gmra.mrb[48].mxu0 %v2630_v38 }
 0x109   :  { %754 = vmatprep.mubr.bf16.mxu0 %v2632_v40 }
 0x110   :  { %755 = vmatmul.mubr.bf16.gmra.mrb[52].mxu0 %v2636_v41 }
 0x111   :  { %762 = vmatprep.mubr.bf16.mxu0 %v2638_v42 }
 0x118   :  { %763 = vmatmul.mubr.bf16.gmra.mrb[56].mxu0 %v2642_v43 }
 0x119   :  { %770 = vmatprep.mubr.bf16.mxu0 %v2644_v44 }
 0x120   :  { %771 = vmatmul.mubr.bf16.gmra.mrb[60].mxu0 %v2648_v45 }
 0x121   :  { %778 = vmatprep.mubr.bf16.mxu0 %v2650_v46 }
 0x128   :  { %779 = vmatmul.mubr.bf16.gmra.mrb[64].mxu0 %v2654_v47 }
 0x163   :  { %v212_v49 = vpop.f32.mrb[0].mxu0 }
 0x164   :  { %v213_v50 = vadd.f32 %v212_v49, %v145_v48  ;;  %v1951_v51 = vpop.f32.mrb[1].mxu0 }
 0x166   :  { %v216_v52 = vmax.f32 %v213_v50, 0.0 }
 0x168   :  { %1985 = vmatmul.mubr.f32.vlgmr.msra.gmra.mrb[0].mxu1 %v216_v52 }
 0x169   :  { %1988 = vmatpush3.bf16.msra.mxu1 %v2209_v31 }
 0x16a   :  { %1989 = vmatprep.subr.bf16.mxu1 %v2210_v53 }
 0x16d   :  { %1990 = vmatpush3.bf16.msra.mxu1 %v2210_v53 }
 0x16e   :  { %1991 = vmatprep.subr.bf16.mxu1 %v2211_v54 }
 0x171   :  { %1992 = vmatpush3.bf16.msra.mxu1 %v2211_v54 }
 0x172   :  { %1993 = vmatprep.subr.bf16.mxu1 %v2212_v55 }
 0x175   :  { %1994 = vmatpush3.bf16.msra.mxu1 %v2212_v55 }
 0x176   :  { %1995 = vmatprep.subr.bf16.mxu1 %v2213_v56 }
 0x179   :  { %1996 = vmatpush3.bf16.msra.mxu1 %v2213_v56 }
 0x17a   :  { %1997 = vmatprep.subr.bf16.mxu1 %v2214_v57 }
 0x17d   :  { %1998 = vmatpush3.bf16.msra.mxu1 %v2214_v57 }
 0x17e   :  { %1999 = vmatprep.subr.bf16.mxu1 %v2215_v58 }
 0x181   :  { %2000 = vmatpush3.bf16.msra.mxu1 %v2215_v58 }
 0x182   :  { %2001 = vmatprep.subr.bf16.mxu1 %v2216_v59 }
 0x183   :  { %v1661_v61 = vpop.f32.mrb[4].mxu0 }
 0x184   :  { %v1662_v62 = vpop.f32.mrb[5].mxu0 }
 0x185   :  { %v1663_v1 = vadd.f32 %v1662_v62, %v1661_v61  ;;  %v1664_v2 = vpop.f32.mrb[6].mxu0  ;;  %2002 = vmatpush3.bf16.msra.mxu1 %v2216_v59 }
 0x186   :  { %v1665_v3 = vpop.f32.mrb[7].mxu0 }
 0x187   :  { %v1666_v4 = vadd.f32 %v1665_v3, %v1664_v2 }
 0x189   :  { %v787_v7 = vpack.c.bf16 %v1666_v4, %v1663_v1 }
 0x18b   :  { %v1667_v8 = vpop.f32.mrb[8].mxu0  ;;  %2003 = vmatprep.mubr.bf16.mxu1 %v787_v7 }
 0x18c   :  { %v1668_v10 = vpop.f32.mrb[9].mxu0 }
 0x18d   :  { %v1669_v11 = vadd.f32 %v1668_v10, %v1667_v8  ;;  %v1670_v12 = vpop.f32.mrb[10].mxu0 }
 0x18e   :  { %v1671_v13 = vpop.f32.mrb[11].mxu0 }
 0x18f   :  { %v1672_v15 = vadd.f32 %v1671_v13, %v1670_v12 }
 0x191   :  { %v788_v16 = vpack.c.bf16 %v1672_v15, %v1669_v11 }
 0x193   :  { %v1673_v18 = vpop.f32.mrb[12].mxu0  ;;  %2004 = vmatmul.mubr.bf16.vlgmr.msra.gmra.mrb[4].mxu1 %v788_v16 }
 0x194   :  { %v1674_v26 = vpop.f32.mrb[13].mxu0 }
 0x195   :  { %v1675_v27 = vadd.f32 %v1674_v26, %v1673_v18  ;;  %v1676_v28 = vpop.f32.mrb[14].mxu0 }
 0x196   :  { %v1677_v31 = vpop.f32.mrb[15].mxu0 }
 0x197   :  { %v1678_v48 = vadd.f32 %v1677_v31, %v1676_v28 }
 0x199   :  { %v789_v49 = vpack.c.bf16 %v1678_v48, %v1675_v27 }
 0x19b   :  { %v1679_v50 = vpop.f32.mrb[16].mxu0  ;;  %2007 = vmatprep.mubr.bf16.mxu1 %v789_v49 }
 0x19c   :  { %v1680_v51 = vpop.f32.mrb[17].mxu0 }
 0x19d   :  { %v1681_v52 = vadd.f32 %v1680_v51, %v1679_v50  ;;  %v1682_v53 = vpop.f32.mrb[18].mxu0 }
 0x19e   :  { %v1683_v54 = vpop.f32.mrb[19].mxu0 }
 0x19f   :  { %v1684_v55 = vadd.f32 %v1683_v54, %v1682_v53 }
 0x1a1   :  { %v790_v56 = vpack.c.bf16 %v1684_v55, %v1681_v52 }
 0x1a3   :  { %v1685_v57 = vpop.f32.mrb[20].mxu0  ;;  %2008 = vmatmul.mubr.bf16.gmra.mrb[8].mxu1 %v790_v56 }
 0x1a4   :  { %v1686_v58 = vpop.f32.mrb[21].mxu0 }
 0x1a5   :  { %v1687_v59 = vadd.f32 %v1686_v58, %v1685_v57  ;;  %v1688_v61 = vpop.f32.mrb[22].mxu0 }
 0x1a6   :  { %v1689_v62 = vpop.f32.mrb[23].mxu0 }
 0x1a7   :  { %v1690_v1 = vadd.f32 %v1689_v62, %v1688_v61 }
 0x1a9   :  { %v791_v2 = vpack.c.bf16 %v1690_v1, %v1687_v59 }
 0x1ab   :  { %v1691_v3 = vpop.f32.mrb[24].mxu0  ;;  %2011 = vmatprep.mubr.bf16.mxu1 %v791_v2 }
 0x1ac   :  { %v1692_v4 = vpop.f32.mrb[25].mxu0 }
 0x1ad   :  { %v1693_v7 = vadd.f32 %v1692_v4, %v1691_v3  ;;  %v1694_v8 = vpop.f32.mrb[26].mxu0 }
 0x1ae   :  { %v1695_v10 = vpop.f32.mrb[27].mxu0 }
 0x1af   :  { %v1696_v11 = vadd.f32 %v1695_v10, %v1694_v8 }
 0x1b1   :  { %v792_v12 = vpack.c.bf16 %v1696_v11, %v1693_v7 }
 0x1b3   :  { %v1697_v13 = vpop.f32.mrb[28].mxu0  ;;  %2012 = vmatmul.mubr.bf16.gmra.mrb[12].mxu1 %v792_v12 }
 0x1b4   :  { %v1698_v15 = vpop.f32.mrb[29].mxu0 }
 0x1b5   :  { %v1699_v16 = vadd.f32 %v1698_v15, %v1697_v13  ;;  %v1700_v18 = vpop.f32.mrb[30].mxu0 }
 0x1b6   :  { %v1701_v26 = vpop.f32.mrb[31].mxu0 }
 0x1b7   :  { %v1702_v27 = vadd.f32 %v1701_v26, %v1700_v18 }
 0x1b9   :  { %v793_v28 = vpack.c.bf16 %v1702_v27, %v1699_v16 }
 0x1bb   :  { %v1703_v31 = vpop.f32.mrb[32].mxu0  ;;  %2015 = vmatprep.mubr.bf16.mxu1 %v793_v28 }
 0x1bc   :  { %v1704_v48 = vpop.f32.mrb[33].mxu0 }
 0x1bd   :  { %v1705_v49 = vadd.f32 %v1704_v48, %v1703_v31  ;;  %v1706_v50 = vpop.f32.mrb[34].mxu0 }
 0x1be   :  { %v1707_v51 = vpop.f32.mrb[35].mxu0 }
 0x1bf   :  { %v1708_v52 = vadd.f32 %v1707_v51, %v1706_v50 }
 0x1c1   :  { %v794_v53 = vpack.c.bf16 %v1708_v52, %v1705_v49 }
 0x1c3   :  { %v1709_v54 = vpop.f32.mrb[36].mxu0  ;;  %2016 = vmatmul.mubr.bf16.gmra.mrb[16].mxu1 %v794_v53 }
 0x1c4   :  { %v1710_v55 = vpop.f32.mrb[37].mxu0 }
 0x1c5   :  { %v1711_v56 = vadd.f32 %v1710_v55, %v1709_v54  ;;  %v1712_v57 = vpop.f32.mrb[38].mxu0 }
 0x1c6   :  { %v1713_v58 = vpop.f32.mrb[39].mxu0 }
 0x1c7   :  { %v1714_v59 = vadd.f32 %v1713_v58, %v1712_v57 }
 0x1c9   :  { %v795_v61 = vpack.c.bf16 %v1714_v59, %v1711_v56 }
 0x1cb   :  { %v1715_v62 = vpop.f32.mrb[40].mxu0  ;;  %2019 = vmatprep.mubr.bf16.mxu1 %v795_v61 }
 0x1cc   :  { %v1716_v1 = vpop.f32.mrb[41].mxu0 }
 0x1cd   :  { %v1717_v2 = vadd.f32 %v1716_v1, %v1715_v62  ;;  %v1718_v3 = vpop.f32.mrb[42].mxu0 }
 0x1ce   :  { %v1719_v4 = vpop.f32.mrb[43].mxu0 }
 0x1cf   :  { %v1720_v7 = vadd.f32 %v1719_v4, %v1718_v3 }
 0x1d1   :  { %v796_v8 = vpack.c.bf16 %v1720_v7, %v1717_v2 }
 0x1d3   :  { %v1721_v10 = vpop.f32.mrb[44].mxu0  ;;  %2020 = vmatmul.mubr.bf16.gmra.mrb[20].mxu1 %v796_v8 }
 0x1d4   :  { %v1722_v11 = vpop.f32.mrb[45].mxu0 }
 0x1d5   :  { %v1723_v12 = vadd.f32 %v1722_v11, %v1721_v10  ;;  %v1724_v13 = vpop.f32.mrb[46].mxu0 }
 0x1d6   :  { %v1725_v15 = vpop.f32.mrb[47].mxu0 }
 0x1d7   :  { %v1726_v16 = vadd.f32 %v1725_v15, %v1724_v13 }
 0x1d9   :  { %v797_v18 = vpack.c.bf16 %v1726_v16, %v1723_v12 }
 0x1db   :  { %v1727_v26 = vpop.f32.mrb[48].mxu0  ;;  %2023 = vmatprep.mubr.bf16.mxu1 %v797_v18 }
 0x1dc   :  { %v1728_v27 = vpop.f32.mrb[49].mxu0 }
 0x1dd   :  { %v1729_v28 = vadd.f32 %v1728_v27, %v1727_v26  ;;  %v1730_v31 = vpop.f32.mrb[50].mxu0 }
 0x1de   :  { %v1731_v48 = vpop.f32.mrb[51].mxu0 }
 0x1df   :  { %v1732_v49 = vadd.f32 %v1731_v48, %v1730_v31  ;;  %v233_v48 = vld [vmem:[%s2805_s5] sm:$0x1]  ;;  %s2402_s5 = smov [#allocation15]  }
 0x1e1   :  { %v798_v50 = vpack.c.bf16 %v1732_v49, %v1729_v28 }
 0x1e3   :  { %v1733_v51 = vpop.f32.mrb[52].mxu0  ;;  %2024 = vmatmul.mubr.bf16.gmra.mrb[24].mxu1 %v798_v50  ;;  %v368_v50 = vld [vmem:[%s2809_s9] sm:$0x1] }
 0x1e4   :  { %v1734_v52 = vpop.f32.mrb[53].mxu0 }
 0x1e5   :  { %v1735_v53 = vadd.f32 %v1734_v52, %v1733_v51  ;;  %v1736_v54 = vpop.f32.mrb[54].mxu0  ;;  %v1602_v51 = vld [vmem:[%s2809_s9 + $0x1] sm:$0x1]  ;;  %v822_v52 = vsub.s32 0, %v2541_v6  ;;  %s1531_s9 = sshll.u32 %s2402_s5, 4  ;;  %s1532_s9 = int_to_ptr.vmem [resolvable:$true] %s1531_s9 }
 0x1e6   :  { %v1737_v55 = vpop.f32.mrb[55].mxu0  ;;  %s2357_s4 = scalar_lea.vmem %s1532_s9, 4096  ;;  %p2362_p7 = scmp.lt.s32.totalorder %s1532_s9, %s1532_s9 }
 0x1e7   :  { %v1738_v56 = vadd.f32 %v1737_v55, %v1736_v54  ;;  %p2358_p6 = scmp.ne.s32.totalorder %s1532_s9, %s2357_s4  ;;  %p2363_p8 = scmp.lt.s32.totalorder %s2357_s4, %s2357_s4 }
 0x1e9   :  { %v799_v57 = vpack.c.bf16 %v1738_v56, %v1735_v53  ;;  %p2364_p9 = por %p2363_p8, %p2362_p7 }
 0x1eb   :  { %v1739_v58 = vpop.f32.mrb[56].mxu0  ;;  %2027 = vmatprep.mubr.bf16.mxu1 %v799_v57  ;;  %p2365_p10 = pnand %p2364_p9, %p2358_p6 }
 0x1ec   :  { %v1740_v59 = vpop.f32.mrb[57].mxu0 }
 0x1ed   :  { %v1741_v61 = vadd.f32 %v1740_v59, %v1739_v58  ;;  %v1742_v62 = vpop.f32.mrb[58].mxu0 }
 0x1ee   :  { %v1743_v1 = vpop.f32.mrb[59].mxu0 }
 0x1ef   :  { %v1744_v2 = vadd.f32 %v1743_v1, %v1742_v62 }
 0x1f1   :  { %v800_v3 = vpack.c.bf16 %v1744_v2, %v1741_v61 }
 0x1f3   :  { %v1745_v4 = vpop.f32.mrb[60].mxu0  ;;  %2028 = vmatmul.mubr.bf16.gmra.mrb[28].mxu1 %v800_v3 }
 0x1f4   :  { %v1746_v7 = vpop.f32.mrb[61].mxu0 }
 0x1f5   :  { %v1747_v8 = vadd.f32 %v1746_v7, %v1745_v4  ;;  %v1748_v10 = vpop.f32.mrb[62].mxu0 }
 0x1f6   :  { %v1749_v11 = vpop.f32.mrb[63].mxu0 }
 0x1f7   :  { %v1750_v12 = vadd.f32 %v1749_v11, %v1748_v10 }
 0x1f9   :  { %v801_v13 = vpack.c.bf16 %v1750_v12, %v1747_v8 }
 0x1fb   :  { %v1751_v15 = vpop.f32.mrb[64].mxu0  ;;  %2031 = vmatprep.mubr.bf16.mxu1 %v801_v13 }
 0x1fc   :  { %v1752_v16 = vpop.f32.mrb[65].mxu0 }
 0x1fd   :  { %v1753_v18 = vadd.f32 %v1752_v16, %v1751_v15  ;;  %v1754_v26 = vpop.f32.mrb[66].mxu0 }
 0x1fe   :  { %v1755_v27 = vpop.f32.mrb[67].mxu0 }
 0x1ff   :  { %v1756_v28 = vadd.f32 %v1755_v27, %v1754_v26 }
 0x201   :  { %v802_v31 = vpack.c.bf16 %v1756_v28, %v1753_v18 }
 0x203   :  { %2032 = vmatmul.mubr.bf16.gmra.mrb[32].mxu1 %v802_v31 }
 0x204   :  { %1117 = vmatprep.mubr.bf16.mxu1 %v2554_v39 }
 0x23b   :  { %v300_v49 = vpop.f32.mrb[0].mxu1 }
 0x23c   :  { %v301_v53 = vadd.f32 %v300_v49, %v233_v48  ;;  %v1986_v54 = vpop.f32.mrb[1].mxu1 }
 0x23e   :  { %v369_v55 = vadd.f32 %v368_v50, %v301_v53  ;;  %v1084_v56 = vadd.f32 %v1602_v51, %v301_v53 }
 0x240   :  { %v2671_v39 = vrot.slane %v369_v55, %v822_v52  ;;  %v2673_v57 = vrot.slane %v1084_v56, %v822_v52 }
 0x266   :  { %v2005_v58 = vpop.f32.mrb[4].mxu1 }
 0x267   :  { %v916_v59 = vadd.f32 %v2005_v58, %v2671_v39  ;;  %v907_v61 = vpop.f32.mrb[5].mxu1 }
 0x268   :  { %v908_v62 = vadd.f32 %v907_v61, %v2671_v39  ;;  %v2006_v1 = vpop.f32.mrb[6].mxu1 }
 0x269   :  { %v919_v2 = vadd.f32 %v2006_v1, %v2671_v39  ;;  %v910_v3 = vpop.f32.mrb[7].mxu1  ;;  %v1036_v4 = vmax.f32 %v916_v59, 0.0 }
 0x26a   :  { %v911_v6 = vadd.f32 %v910_v3, %v2671_v39  ;;  %v1034_v8 = vmax.f32 %v908_v62, 0.0 }
 0x26b   :  { %v1037_v7 = vmax.f32 %v919_v2, 0.0 }
 0x26c   :  { %v1035_v10 = vmax.f32 %v911_v6, 0.0 }
 0x26d   :  { %v1067_v11 = vpack.c.bf16 %v1037_v7, %v1036_v4 }
 0x26e   :  { %v1066_v12 = vpack.c.bf16 %v1035_v10, %v1034_v8 }
 0x276   :  { %v2009_v13 = vpop.f32.mrb[8].mxu1 }
 0x277   :  { %v932_v15 = vadd.f32 %v2009_v13, %v2671_v39  ;;  %v923_v16 = vpop.f32.mrb[9].mxu1 }
 0x278   :  { %v924_v18 = vadd.f32 %v923_v16, %v2671_v39  ;;  %v2010_v26 = vpop.f32.mrb[10].mxu1 }
 0x279   :  { %v935_v27 = vadd.f32 %v2010_v26, %v2671_v39  ;;  %v926_v28 = vpop.f32.mrb[11].mxu1  ;;  %v1040_v48 = vmax.f32 %v932_v15, 0.0 }
 0x27a   :  { %v927_v31 = vadd.f32 %v926_v28, %v2671_v39  ;;  %v1038_v50 = vmax.f32 %v924_v18, 0.0 }
 0x27b   :  { %v1041_v49 = vmax.f32 %v935_v27, 0.0 }
 0x27c   :  { %v1039_v51 = vmax.f32 %v927_v31, 0.0 }
 0x27d   :  { %v2683_v52 = vpack.c.bf16 %v1041_v49, %v1040_v48 }
 0x27e   :  { %v1068_v53 = vpack.c.bf16 %v1039_v51, %v1038_v50 }
 0x286   :  { %v2013_v54 = vpop.f32.mrb[12].mxu1 }
 0x287   :  { %v948_v55 = vadd.f32 %v2013_v54, %v2671_v39  ;;  %v939_v56 = vpop.f32.mrb[13].mxu1 }
 0x288   :  { %v940_v58 = vadd.f32 %v939_v56, %v2671_v39  ;;  %v2014_v59 = vpop.f32.mrb[14].mxu1 }
 0x289   :  { %v951_v61 = vadd.f32 %v2014_v59, %v2671_v39  ;;  %v942_v62 = vpop.f32.mrb[15].mxu1  ;;  %v1044_v2 = vmax.f32 %v948_v55, 0.0 }
 0x28a   :  { %v943_v1 = vadd.f32 %v942_v62, %v2671_v39  ;;  %v1042_v6 = vmax.f32 %v940_v58, 0.0 }
 0x28b   :  { %v1045_v3 = vmax.f32 %v951_v61, 0.0 }
 0x28c   :  { %v1043_v4 = vmax.f32 %v943_v1, 0.0 }
 0x28d   :  { %v2689_v7 = vpack.c.bf16 %v1045_v3, %v1044_v2 }
 0x28e   :  { %v2691_v8 = vpack.c.bf16 %v1043_v4, %v1042_v6 }
 0x296   :  { %v2017_v10 = vpop.f32.mrb[16].mxu1 }
 0x297   :  { %v964_v13 = vadd.f32 %v2017_v10, %v2671_v39  ;;  %v955_v15 = vpop.f32.mrb[17].mxu1 }
 0x298   :  { %v956_v16 = vadd.f32 %v955_v15, %v2671_v39  ;;  %v2018_v18 = vpop.f32.mrb[18].mxu1 }
 0x299   :  { %v967_v26 = vadd.f32 %v2018_v18, %v2671_v39  ;;  %v958_v27 = vpop.f32.mrb[19].mxu1  ;;  %v1048_v31 = vmax.f32 %v964_v13, 0.0 }
 0x29a   :  { %v959_v28 = vadd.f32 %v958_v27, %v2671_v39  ;;  %v1046_v49 = vmax.f32 %v956_v16, 0.0 }
 0x29b   :  { %v1049_v48 = vmax.f32 %v967_v26, 0.0 }
 0x29c   :  { %v1047_v50 = vmax.f32 %v959_v28, 0.0 }
 0x29d   :  { %v2697_v51 = vpack.c.bf16 %v1049_v48, %v1048_v31 }
 0x29e   :  { %v2699_v54 = vpack.c.bf16 %v1047_v50, %v1046_v49 }
 0x2a6   :  { %v2021_v55 = vpop.f32.mrb[20].mxu1 }
 0x2a7   :  { %v980_v56 = vadd.f32 %v2021_v55, %v2671_v39  ;;  %v971_v58 = vpop.f32.mrb[21].mxu1 }
 0x2a8   :  { %v972_v59 = vadd.f32 %v971_v58, %v2671_v39  ;;  %v2022_v61 = vpop.f32.mrb[22].mxu1 }
 0x2a9   :  { %v983_v62 = vadd.f32 %v2022_v61, %v2671_v39  ;;  %v974_v1 = vpop.f32.mrb[23].mxu1  ;;  %v1052_v3 = vmax.f32 %v980_v56, 0.0 }
 0x2aa   :  { %v975_v2 = vadd.f32 %v974_v1, %v2671_v39  ;;  %v1050_v4 = vmax.f32 %v972_v59, 0.0 }
 0x2ab   :  { %v1053_v6 = vmax.f32 %v983_v62, 0.0 }
 0x2ac   :  { %v1051_v10 = vmax.f32 %v975_v2, 0.0 }
 0x2ad   :  { %v1075_v13 = vpack.c.bf16 %v1053_v6, %v1052_v3 }
 0x2ae   :  { %v1074_v15 = vpack.c.bf16 %v1051_v10, %v1050_v4 }
 0x2b0   :  { %1781 = vmatprep.subr.bf16.mxu1 %v1074_v15 }
 0x2b1   :  { %1782 = vmatpush3.bf16.msra.mxu1 %v1066_v12 }
 0x2b2   :  { %1783 = vmatprep.subr.bf16.mxu1 %v1075_v13 }
 0x2b5   :  { %1784 = vmatpush3.bf16.msra.mxu1 %v1067_v11 }
 0x2b6   :  { %v2025_v16 = vpop.f32.mrb[24].mxu1 }
 0x2b7   :  { %v996_v18 = vadd.f32 %v2025_v16, %v2671_v39  ;;  %v987_v26 = vpop.f32.mrb[25].mxu1 }
 0x2b8   :  { %v988_v27 = vadd.f32 %v987_v26, %v2671_v39  ;;  %v2026_v28 = vpop.f32.mrb[26].mxu1 }
 0x2b9   :  { %v999_v31 = vadd.f32 %v2026_v28, %v2671_v39  ;;  %v990_v48 = vpop.f32.mrb[27].mxu1  ;;  %v1056_v50 = vmax.f32 %v996_v18, 0.0 }
 0x2ba   :  { %v991_v49 = vadd.f32 %v990_v48, %v2671_v39  ;;  %v1054_v56 = vmax.f32 %v988_v27, 0.0 }
 0x2bb   :  { %v1057_v55 = vmax.f32 %v999_v31, 0.0 }
 0x2bc   :  { %v1055_v58 = vmax.f32 %v991_v49, 0.0 }
 0x2bd   :  { %v1077_v59 = vpack.c.bf16 %v1057_v55, %v1056_v50 }
 0x2be   :  { %v1076_v12 = vpack.c.bf16 %v1055_v58, %v1054_v56 }
 0x2c0   :  { %1785 = vmatprep.subr.bf16.mxu1 %v1076_v12 }
 0x2c1   :  { %1786 = vmatpush3.bf16.msra.mxu1 %v1068_v53 }
 0x2c2   :  { %1787 = vmatprep.subr.bf16.mxu1 %v1077_v59 }
 0x2c5   :  { %1788 = vmatpush3.bf16.msra.mxu1 %v2683_v52 }
 0x2c6   :  { %v2029_v11 = vpop.f32.mrb[28].mxu1 }
 0x2c7   :  { %v1012_v61 = vadd.f32 %v2029_v11, %v2671_v39  ;;  %v1003_v62 = vpop.f32.mrb[29].mxu1  ;;  %v2218_v11 = vld [vmem:[#allocation13 + $0x48] sm:$0xff]  }
 0x2c8   :  { %v1004_v1 = vadd.f32 %v1003_v62, %v2671_v39  ;;  %v2030_v2 = vpop.f32.mrb[30].mxu1  ;;  %v2221_v62 = vld [vmem:[#allocation13 + $0x60] sm:$0xff]  }
 0x2c9   :  { %v1015_v3 = vadd.f32 %v2030_v2, %v2671_v39  ;;  %v1006_v6 = vpop.f32.mrb[31].mxu1  ;;  %v1060_v10 = vmax.f32 %v1012_v61, 0.0  ;;  %v2219_v61 = vld [vmem:[#allocation13 + $0x50] sm:$0xff]  }
 0x2ca   :  { %v1007_v4 = vadd.f32 %v1006_v6, %v2671_v39  ;;  %v1058_v15 = vmax.f32 %v1004_v1, 0.0 }
 0x2cb   :  { %v1061_v13 = vmax.f32 %v1015_v3, 0.0 }
 0x2cc   :  { %v1059_v16 = vmax.f32 %v1007_v4, 0.0 }
 0x2cd   :  { %v1079_v53 = vpack.c.bf16 %v1061_v13, %v1060_v10 }
 0x2ce   :  { %v1078_v18 = vpack.c.bf16 %v1059_v16, %v1058_v15 }
 0x2d0   :  { %1789 = vmatprep.subr.bf16.mxu1 %v1078_v18 }
 0x2d1   :  { %1790 = vmatpush3.bf16.msra.mxu1 %v2691_v8 }
 0x2d2   :  { %1791 = vmatprep.subr.bf16.mxu1 %v1079_v53 }
 0x2d5   :  { %1792 = vmatpush3.bf16.msra.mxu1 %v2689_v7  ;;  %v2217_v7 = vld [vmem:[#allocation13 + $0x40] sm:$0xff]  }
 0x2d6   :  { %v2033_v52 = vpop.f32.mrb[32].mxu1  ;;  %2035 = vmatprep.subr.bf16.mxu0 %v2217_v7 }
 0x2d7   :  { %v1028_v26 = vadd.f32 %v2033_v52, %v2671_v39  ;;  %v1019_v27 = vpop.f32.mrb[33].mxu1  ;;  %2036 = vmatpush3.bf16.msra.mxu0 %v2217_v7 }
 0x2d8   :  { %v1020_v28 = vadd.f32 %v1019_v27, %v2671_v39  ;;  %v2034_v31 = vpop.f32.mrb[34].mxu1  ;;  %2037 = vmatprep.subr.bf16.mxu0 %v2218_v11 }
 0x2d9   :  { %v1031_v48 = vadd.f32 %v2034_v31, %v2671_v39  ;;  %v1022_v49 = vpop.f32.mrb[35].mxu1  ;;  %v1064_v55 = vmax.f32 %v1028_v26, 0.0 }
 0x2da   :  { %v1023_v50 = vadd.f32 %v1022_v49, %v2671_v39  ;;  %v1062_v58 = vmax.f32 %v1020_v28, 0.0  ;;  %v2220_v39 = vld [vmem:[#allocation13 + $0x58] sm:$0xff]  }
 0x2db   :  { %v1065_v56 = vmax.f32 %v1031_v48, 0.0  ;;  %2038 = vmatpush3.bf16.msra.mxu0 %v2218_v11 }
 0x2dc   :  { %v1063_v59 = vmax.f32 %v1023_v50, 0.0  ;;  %2039 = vmatprep.subr.bf16.mxu0 %v2219_v61 }
 0x2dd   :  { %v1081_v8 = vpack.c.bf16 %v1065_v56, %v1064_v55 }
 0x2de   :  { %v1080_v12 = vpack.c.bf16 %v1063_v59, %v1062_v58 }
 0x2df   :  { %2040 = vmatpush3.bf16.msra.mxu0 %v2219_v61 }
 0x2e0   :  { %1793 = vmatprep.subr.bf16.mxu1 %v1080_v12  ;;  %2041 = vmatprep.subr.bf16.mxu0 %v2220_v39 }
 0x2e1   :  { %1794 = vmatpush3.bf16.msra.mxu1 %v2699_v54 }
 0x2e2   :  { %1795 = vmatprep.subr.bf16.mxu1 %v1081_v8 }
 0x2e3   :  { %2042 = vmatpush3.bf16.msra.mxu0 %v2220_v39 }
 0x2e4   :  { %2043 = vmatprep.subr.bf16.mxu0 %v2221_v62 }
 0x2e5   :  { %1796 = vmatpush3.bf16.msra.mxu1 %v2697_v51 }
 0x2e7   :  { %2044 = vmatpush3.bf16.msra.mxu0 %v2221_v62 }
 0x2e8   :  { %1118 = vmatmul.mubr.bf16.vlgmr.msra.gmra.mrb[36].mxu1 %v2557_v60  ;;  %v2222_v60 = vld [vmem:[#allocation13 + $0x68] sm:$0xff]  }
 0x2e9   :  { %1125 = vmatprep.mubr.bf16.mxu1 %v2560_v63  ;;  %2045 = vmatprep.subr.bf16.mxu0 %v2222_v60  ;;  %v2223_v63 = vld [vmem:[#allocation13 + $0x70] sm:$0xff]  }
 0x2eb   :  { %2046 = vmatpush3.bf16.msra.mxu0 %v2222_v60 }
 0x2ec   :  { %2047 = vmatprep.subr.bf16.mxu0 %v2223_v63 }
 0x2ef   :  { %2048 = vmatpush3.bf16.msra.mxu0 %v2223_v63 }
 0x2f0   :  { %1126 = vmatmul.mubr.bf16.gmra.mrb[40].mxu1 %v2565_v5  ;;  %v2224_v5 = vld [vmem:[#allocation13 + $0x78] sm:$0xff]  }
 0x2f1   :  { %1133 = vmatprep.mubr.bf16.mxu1 %v2568_v9  ;;  %2049 = vmatprep.subr.bf16.mxu0 %v2224_v5 }
 0x2f3   :  { %2050 = vmatpush3.bf16.msra.mxu0 %v2224_v5 }
 0x2f8   :  { %1134 = vmatmul.mubr.bf16.gmra.mrb[44].mxu1 %v2573_v14 }
 0x2f9   :  { %1141 = vmatprep.mubr.bf16.mxu1 %v2576_v17 }
 0x300   :  { %1142 = vmatmul.mubr.bf16.gmra.mrb[48].mxu1 %v2581_v19 }
 0x301   :  { %1149 = vmatprep.mubr.bf16.mxu1 %v2584_v20 }
 0x308   :  { %1150 = vmatmul.mubr.bf16.gmra.mrb[52].mxu1 %v2588_v21 }
 0x309   :  { %1157 = vmatprep.mubr.bf16.mxu1 %v2590_v22 }
 0x310   :  { %1158 = vmatmul.mubr.bf16.gmra.mrb[56].mxu1 %v2594_v23 }
 0x311   :  { %1165 = vmatprep.mubr.bf16.mxu1 %v2596_v24 }
 0x318   :  { %1166 = vmatmul.mubr.bf16.gmra.mrb[60].mxu1 %v2600_v0 }
 0x319   :  { %1173 = vmatprep.mubr.bf16.mxu1 %v2602_v25 }
 0x320   :  { %1174 = vmatmul.mubr.bf16.gmra.mrb[64].mxu1 %v2606_v29 }
 0x321   :  { %1181 = vmatprep.mubr.bf16.mxu1 %v2608_v30 }
 0x328   :  { %1182 = vmatmul.mubr.bf16.gmra.mrb[68].mxu1 %v2612_v32 }
 0x329   :  { %1189 = vmatprep.mubr.bf16.mxu1 %v2614_v33 }
 0x330   :  { %1190 = vmatmul.mubr.bf16.gmra.mrb[72].mxu1 %v2618_v34 }
 0x331   :  { %1197 = vmatprep.mubr.bf16.mxu1 %v2620_v35 }
 0x338   :  { %1198 = vmatmul.mubr.bf16.gmra.mrb[76].mxu1 %v2624_v36 }
 0x339   :  { %1205 = vmatprep.mubr.bf16.mxu1 %v2626_v37 }
 0x340   :  { %1206 = vmatmul.mubr.bf16.gmra.mrb[80].mxu1 %v2630_v38 }
 0x341   :  { %1213 = vmatprep.mubr.bf16.mxu1 %v2632_v40 }
 0x348   :  { %1214 = vmatmul.mubr.bf16.gmra.mrb[84].mxu1 %v2636_v41 }
 0x349   :  { %1221 = vmatprep.mubr.bf16.mxu1 %v2638_v42 }
 0x350   :  { %1222 = vmatmul.mubr.bf16.gmra.mrb[88].mxu1 %v2642_v43 }
 0x351   :  { %1229 = vmatprep.mubr.bf16.mxu1 %v2644_v44 }
 0x358   :  { %1230 = vmatmul.mubr.bf16.gmra.mrb[92].mxu1 %v2648_v45 }
 0x359   :  { %1237 = vmatprep.mubr.bf16.mxu1 %v2650_v46 }
 0x360   :  { %1238 = vmatmul.mubr.bf16.gmra.mrb[96].mxu1 %v2654_v47 }
 0x3bb   :  { %v1797_v9 = vpop.f32.mrb[36].mxu1 }
 0x3bc   :  { %v1798_v14 = vpop.f32.mrb[37].mxu1 }
 0x3bd   :  { %v1799_v17 = vadd.f32 %v1798_v14, %v1797_v9  ;;  %v1800_v19 = vpop.f32.mrb[38].mxu1 }
 0x3be   :  { %v1801_v20 = vpop.f32.mrb[39].mxu1 }
 0x3bf   :  { %v1802_v21 = vadd.f32 %v1801_v20, %v1800_v19 }
 0x3c1   :  { %v1246_v22 = vpack.c.bf16 %v1802_v21, %v1799_v17 }
 0x3c3   :  { %v1803_v23 = vpop.f32.mrb[40].mxu1  ;;  %2051 = vmatprep.mubr.bf16.mxu0 %v1246_v22 }
 0x3c4   :  { %v1804_v24 = vpop.f32.mrb[41].mxu1 }
 0x3c5   :  { %v1805_v0 = vadd.f32 %v1804_v24, %v1803_v23  ;;  %v1806_v25 = vpop.f32.mrb[42].mxu1 }
 0x3c6   :  { %v1807_v29 = vpop.f32.mrb[43].mxu1 }
 0x3c7   :  { %v1808_v30 = vadd.f32 %v1807_v29, %v1806_v25 }
 0x3c9   :  { %v1247_v32 = vpack.c.bf16 %v1808_v30, %v1805_v0 }
 0x3cb   :  { %2052 = vmatmul.mubr.bf16.vlgmr.msra.gmra.mrb[68].mxu0 %v1247_v32  ;;  %v1809_v33 = vpop.f32.mrb[44].mxu1 }
 0x3cc   :  { %v1810_v34 = vpop.f32.mrb[45].mxu1 }
 0x3cd   :  { %v1811_v35 = vadd.f32 %v1810_v34, %v1809_v33  ;;  %v1812_v36 = vpop.f32.mrb[46].mxu1 }
 0x3ce   :  { %v1813_v37 = vpop.f32.mrb[47].mxu1 }
 0x3cf   :  { %v1814_v38 = vadd.f32 %v1813_v37, %v1812_v36 }
 0x3d1   :  { %v1248_v40 = vpack.c.bf16 %v1814_v38, %v1811_v35 }
 0x3d3   :  { %v1815_v41 = vpop.f32.mrb[48].mxu1  ;;  %2055 = vmatprep.mubr.bf16.mxu0 %v1248_v40 }
 0x3d4   :  { %v1816_v42 = vpop.f32.mrb[49].mxu1 }
 0x3d5   :  { %v1817_v43 = vadd.f32 %v1816_v42, %v1815_v41  ;;  %v1818_v44 = vpop.f32.mrb[50].mxu1 }
 0x3d6   :  { %v1819_v45 = vpop.f32.mrb[51].mxu1 }
 0x3d7   :  { %v1820_v46 = vadd.f32 %v1819_v45, %v1818_v44 }
 0x3d9   :  { %v1249_v47 = vpack.c.bf16 %v1820_v46, %v1817_v43 }
 0x3db   :  { %2056 = vmatmul.mubr.bf16.gmra.mrb[72].mxu0 %v1249_v47  ;;  %v1821_v51 = vpop.f32.mrb[52].mxu1 }
 0x3dc   :  { %v1822_v54 = vpop.f32.mrb[53].mxu1 }
 0x3dd   :  { %v1823_v1 = vadd.f32 %v1822_v54, %v1821_v51  ;;  %v1824_v2 = vpop.f32.mrb[54].mxu1 }
 0x3de   :  { %v1825_v3 = vpop.f32.mrb[55].mxu1 }
 0x3df   :  { %v1826_v6 = vadd.f32 %v1825_v3, %v1824_v2 }
 0x3e1   :  { %v1250_v4 = vpack.c.bf16 %v1826_v6, %v1823_v1 }
 0x3e3   :  { %v1827_v10 = vpop.f32.mrb[56].mxu1  ;;  %2059 = vmatprep.mubr.bf16.mxu0 %v1250_v4 }
 0x3e4   :  { %v1828_v13 = vpop.f32.mrb[57].mxu1 }
 0x3e5   :  { %v1829_v15 = vadd.f32 %v1828_v13, %v1827_v10  ;;  %v1830_v16 = vpop.f32.mrb[58].mxu1 }
 0x3e6   :  { %v1831_v53 = vpop.f32.mrb[59].mxu1 }
 0x3e7   :  { %v1832_v18 = vadd.f32 %v1831_v53, %v1830_v16 }
 0x3e9   :  { %v1251_v52 = vpack.c.bf16 %v1832_v18, %v1829_v15 }
 0x3eb   :  { %2060 = vmatmul.mubr.bf16.gmra.mrb[76].mxu0 %v1251_v52  ;;  %v1833_v26 = vpop.f32.mrb[60].mxu1 }
 0x3ec   :  { %v1834_v27 = vpop.f32.mrb[61].mxu1 }
 0x3ed   :  { %v1835_v28 = vadd.f32 %v1834_v27, %v1833_v26  ;;  %v1836_v31 = vpop.f32.mrb[62].mxu1 }
 0x3ee   :  { %v1837_v48 = vpop.f32.mrb[63].mxu1 }
 0x3ef   :  { %v1838_v49 = vadd.f32 %v1837_v48, %v1836_v31 }
 0x3f1   :  { %v1252_v50 = vpack.c.bf16 %v1838_v49, %v1835_v28 }
 0x3f3   :  { %v1839_v55 = vpop.f32.mrb[64].mxu1  ;;  %2063 = vmatprep.mubr.bf16.mxu0 %v1252_v50 }
 0x3f4   :  { %v1840_v56 = vpop.f32.mrb[65].mxu1 }
 0x3f5   :  { %v1841_v58 = vadd.f32 %v1840_v56, %v1839_v55  ;;  %v1842_v59 = vpop.f32.mrb[66].mxu1 }
 0x3f6   :  { %v1843_v8 = vpop.f32.mrb[67].mxu1 }
 0x3f7   :  { %v1844_v12 = vadd.f32 %v1843_v8, %v1842_v59 }
 0x3f9   :  { %v1253_v7 = vpack.c.bf16 %v1844_v12, %v1841_v58 }
 0x3fb   :  { %2064 = vmatmul.mubr.bf16.gmra.mrb[80].mxu0 %v1253_v7  ;;  %v1845_v11 = vpop.f32.mrb[68].mxu1 }
 0x3fc   :  { %v1846_v61 = vpop.f32.mrb[69].mxu1 }
 0x3fd   :  { %v1847_v39 = vadd.f32 %v1846_v61, %v1845_v11  ;;  %v1848_v62 = vpop.f32.mrb[70].mxu1 }
 0x3fe   :  { %v1849_v60 = vpop.f32.mrb[71].mxu1 }
 0x3ff   :  { %v1850_v63 = vadd.f32 %v1849_v60, %v1848_v62 }
 0x401   :  { %v1254_v5 = vpack.c.bf16 %v1850_v63, %v1847_v39 }
 0x403   :  { %v1851_v9 = vpop.f32.mrb[72].mxu1  ;;  %2067 = vmatprep.mubr.bf16.mxu0 %v1254_v5 }
 0x404   :  { %v1852_v14 = vpop.f32.mrb[73].mxu1 }
 0x405   :  { %v1853_v17 = vadd.f32 %v1852_v14, %v1851_v9  ;;  %v1854_v19 = vpop.f32.mrb[74].mxu1 }
 0x406   :  { %v1855_v20 = vpop.f32.mrb[75].mxu1 }
 0x407   :  { %v1856_v21 = vadd.f32 %v1855_v20, %v1854_v19 }
 0x409   :  { %v1255_v22 = vpack.c.bf16 %v1856_v21, %v1853_v17 }
 0x40b   :  { %2068 = vmatmul.mubr.bf16.gmra.mrb[84].mxu0 %v1255_v22  ;;  %v1857_v23 = vpop.f32.mrb[76].mxu1 }
 0x40c   :  { %v1858_v24 = vpop.f32.mrb[77].mxu1 }
 0x40d   :  { %v1859_v0 = vadd.f32 %v1858_v24, %v1857_v23  ;;  %v1860_v25 = vpop.f32.mrb[78].mxu1 }
 0x40e   :  { %v1861_v29 = vpop.f32.mrb[79].mxu1 }
 0x40f   :  { %v1862_v30 = vadd.f32 %v1861_v29, %v1860_v25 }
 0x411   :  { %v1256_v32 = vpack.c.bf16 %v1862_v30, %v1859_v0 }
 0x413   :  { %v1863_v33 = vpop.f32.mrb[80].mxu1  ;;  %2071 = vmatprep.mubr.bf16.mxu0 %v1256_v32 }
 0x414   :  { %v1864_v34 = vpop.f32.mrb[81].mxu1 }
 0x415   :  { %v1865_v35 = vadd.f32 %v1864_v34, %v1863_v33  ;;  %v1866_v36 = vpop.f32.mrb[82].mxu1 }
 0x416   :  { %v1867_v37 = vpop.f32.mrb[83].mxu1 }
 0x417   :  { %v1868_v38 = vadd.f32 %v1867_v37, %v1866_v36 }
 0x419   :  { %v1257_v40 = vpack.c.bf16 %v1868_v38, %v1865_v35 }
 0x41b   :  { %2072 = vmatmul.mubr.bf16.gmra.mrb[88].mxu0 %v1257_v40  ;;  %v1869_v41 = vpop.f32.mrb[84].mxu1 }
 0x41c   :  { %v1870_v42 = vpop.f32.mrb[85].mxu1 }
 0x41d   :  { %v1871_v43 = vadd.f32 %v1870_v42, %v1869_v41  ;;  %v1872_v44 = vpop.f32.mrb[86].mxu1 }
 0x41e   :  { %v1873_v45 = vpop.f32.mrb[87].mxu1 }
 0x41f   :  { %v1874_v46 = vadd.f32 %v1873_v45, %v1872_v44 }
 0x421   :  { %v1258_v47 = vpack.c.bf16 %v1874_v46, %v1871_v43 }
 0x423   :  { %v1875_v51 = vpop.f32.mrb[88].mxu1  ;;  %2075 = vmatprep.mubr.bf16.mxu0 %v1258_v47 }
 0x424   :  { %v1876_v54 = vpop.f32.mrb[89].mxu1 }
 0x425   :  { %v1877_v1 = vadd.f32 %v1876_v54, %v1875_v51  ;;  %v1878_v2 = vpop.f32.mrb[90].mxu1 }
 0x426   :  { %v1879_v3 = vpop.f32.mrb[91].mxu1 }
 0x427   :  { %v1880_v6 = vadd.f32 %v1879_v3, %v1878_v2 }
 0x429   :  { %v1259_v4 = vpack.c.bf16 %v1880_v6, %v1877_v1 }
 0x42b   :  { %2076 = vmatmul.mubr.bf16.gmra.mrb[92].mxu0 %v1259_v4  ;;  %v1881_v10 = vpop.f32.mrb[92].mxu1 }
 0x42c   :  { %v1882_v13 = vpop.f32.mrb[93].mxu1 }
 0x42d   :  { %v1883_v15 = vadd.f32 %v1882_v13, %v1881_v10  ;;  %v1884_v16 = vpop.f32.mrb[94].mxu1 }
 0x42e   :  { %v1885_v53 = vpop.f32.mrb[95].mxu1 }
 0x42f   :  { %v1886_v18 = vadd.f32 %v1885_v53, %v1884_v16 }
 0x431   :  { %v1260_v52 = vpack.c.bf16 %v1886_v18, %v1883_v15 }
 0x433   :  { %v1887_v26 = vpop.f32.mrb[96].mxu1  ;;  %2079 = vmatprep.mubr.bf16.mxu0 %v1260_v52 }
 0x434   :  { %v1888_v27 = vpop.f32.mrb[97].mxu1 }
 0x435   :  { %v1889_v28 = vadd.f32 %v1888_v27, %v1887_v26  ;;  %v1890_v31 = vpop.f32.mrb[98].mxu1 }
 0x436   :  { %v1891_v48 = vpop.f32.mrb[99].mxu1 }
 0x437   :  { %v1892_v49 = vadd.f32 %v1891_v48, %v1890_v31 }
 0x439   :  { %v1261_v50 = vpack.c.bf16 %v1892_v49, %v1889_v28 }
 0x43b   :  { %2080 = vmatmul.mubr.bf16.gmra.mrb[96].mxu0 %v1261_v50 }
 0x49e   :  { %v2053_v55 = vpop.f32.mrb[68].mxu0 }
 0x49f   :  { %v1376_v56 = vadd.f32 %v2053_v55, %v2673_v57  ;;  %v1367_v58 = vpop.f32.mrb[69].mxu0 }
 0x4a0   :  { %v1368_v59 = vadd.f32 %v1367_v58, %v2673_v57  ;;  %v2054_v8 = vpop.f32.mrb[70].mxu0 }
 0x4a1   :  { %1496 = vst [vmem:[#allocation15 + $0x10] sm:$0xff] %v1376_v56  ;;  %v1379_v12 = vadd.f32 %v2054_v8, %v2673_v57  ;;  %v1370_v7 = vpop.f32.mrb[71].mxu0 }
 0x4a2   :  { %1494 = vst [vmem:[#allocation15] sm:$0xff] %v1368_v59  ;;  %v1371_v11 = vadd.f32 %v1370_v7, %v2673_v57 }
 0x4a3   :  { %1497 = vst [vmem:[#allocation15 + $0x18] sm:$0xff] %v1379_v12 }
 0x4a4   :  { %1495 = vst [vmem:[#allocation15 + $0x8] sm:$0xff] %v1371_v11 }
 0x4ae   :  { %v2057_v61 = vpop.f32.mrb[72].mxu0 }
 0x4af   :  { %v1392_v39 = vadd.f32 %v2057_v61, %v2673_v57  ;;  %v1383_v62 = vpop.f32.mrb[73].mxu0 }
 0x4b0   :  { %v1384_v60 = vadd.f32 %v1383_v62, %v2673_v57  ;;  %v2058_v63 = vpop.f32.mrb[74].mxu0 }
 0x4b1   :  { %1500 = vst [vmem:[#allocation15 + $0x30] sm:$0xff] %v1392_v39  ;;  %v1395_v5 = vadd.f32 %v2058_v63, %v2673_v57  ;;  %v1386_v9 = vpop.f32.mrb[75].mxu0 }
 0x4b2   :  { %1498 = vst [vmem:[#allocation15 + $0x20] sm:$0xff] %v1384_v60  ;;  %v1387_v14 = vadd.f32 %v1386_v9, %v2673_v57 }
 0x4b3   :  { %1501 = vst [vmem:[#allocation15 + $0x38] sm:$0xff] %v1395_v5 }
 0x4b4   :  { %1499 = vst [vmem:[#allocation15 + $0x28] sm:$0xff] %v1387_v14 }
 0x4be   :  { %v2061_v17 = vpop.f32.mrb[76].mxu0 }
 0x4bf   :  { %v1408_v19 = vadd.f32 %v2061_v17, %v2673_v57  ;;  %v1399_v20 = vpop.f32.mrb[77].mxu0 }
 0x4c0   :  { %v1400_v21 = vadd.f32 %v1399_v20, %v2673_v57  ;;  %v2062_v22 = vpop.f32.mrb[78].mxu0 }
 0x4c1   :  { %1504 = vst [vmem:[#allocation15 + $0x50] sm:$0xff] %v1408_v19  ;;  %v1411_v23 = vadd.f32 %v2062_v22, %v2673_v57  ;;  %v1402_v24 = vpop.f32.mrb[79].mxu0 }
 0x4c2   :  { %1502 = vst [vmem:[#allocation15 + $0x40] sm:$0xff] %v1400_v21  ;;  %v1403_v0 = vadd.f32 %v1402_v24, %v2673_v57 }
 0x4c3   :  { %1505 = vst [vmem:[#allocation15 + $0x58] sm:$0xff] %v1411_v23 }
 0x4c4   :  { %1503 = vst [vmem:[#allocation15 + $0x48] sm:$0xff] %v1403_v0 }
 0x4ce   :  { %v2065_v25 = vpop.f32.mrb[80].mxu0 }
 0x4cf   :  { %v1424_v29 = vadd.f32 %v2065_v25, %v2673_v57  ;;  %v1415_v30 = vpop.f32.mrb[81].mxu0 }
 0x4d0   :  { %v1416_v32 = vadd.f32 %v1415_v30, %v2673_v57  ;;  %v2066_v33 = vpop.f32.mrb[82].mxu0 }
 0x4d1   :  { %1508 = vst [vmem:[#allocation15 + $0x70] sm:$0xff] %v1424_v29  ;;  %v1427_v34 = vadd.f32 %v2066_v33, %v2673_v57  ;;  %v1418_v35 = vpop.f32.mrb[83].mxu0 }
 0x4d2   :  { %1506 = vst [vmem:[#allocation15 + $0x60] sm:$0xff] %v1416_v32  ;;  %v1419_v36 = vadd.f32 %v1418_v35, %v2673_v57 }
 0x4d3   :  { %1509 = vst [vmem:[#allocation15 + $0x78] sm:$0xff] %v1427_v34 }
 0x4d4   :  { %1507 = vst [vmem:[#allocation15 + $0x68] sm:$0xff] %v1419_v36 }
 0x4de   :  { %v2069_v37 = vpop.f32.mrb[84].mxu0 }
 0x4df   :  { %v1440_v38 = vadd.f32 %v2069_v37, %v2673_v57  ;;  %v1431_v40 = vpop.f32.mrb[85].mxu0 }
 0x4e0   :  { %v1432_v41 = vadd.f32 %v1431_v40, %v2673_v57  ;;  %v2070_v42 = vpop.f32.mrb[86].mxu0 }
 0x4e1   :  { %1512 = vst [vmem:[#allocation15 + $0x90] sm:$0xff] %v1440_v38  ;;  %v1443_v43 = vadd.f32 %v2070_v42, %v2673_v57  ;;  %v1434_v44 = vpop.f32.mrb[87].mxu0 }
 0x4e2   :  { %1510 = vst [vmem:[#allocation15 + $0x80] sm:$0xff] %v1432_v41  ;;  %v1435_v45 = vadd.f32 %v1434_v44, %v2673_v57 }
 0x4e3   :  { %1513 = vst [vmem:[#allocation15 + $0x98] sm:$0xff] %v1443_v43 }
 0x4e4   :  { %1511 = vst [vmem:[#allocation15 + $0x88] sm:$0xff] %v1435_v45 }
 0x4ee   :  { %v2073_v46 = vpop.f32.mrb[88].mxu0 }
 0x4ef   :  { %v1456_v47 = vadd.f32 %v2073_v46, %v2673_v57  ;;  %v1447_v51 = vpop.f32.mrb[89].mxu0 }
 0x4f0   :  { %v1448_v54 = vadd.f32 %v1447_v51, %v2673_v57  ;;  %v2074_v1 = vpop.f32.mrb[90].mxu0 }
 0x4f1   :  { %1516 = vst [vmem:[#allocation15 + $0xb0] sm:$0xff] %v1456_v47  ;;  %v1459_v2 = vadd.f32 %v2074_v1, %v2673_v57  ;;  %v1450_v3 = vpop.f32.mrb[91].mxu0 }
 0x4f2   :  { %1514 = vst [vmem:[#allocation15 + $0xa0] sm:$0xff] %v1448_v54  ;;  %v1451_v6 = vadd.f32 %v1450_v3, %v2673_v57 }
 0x4f3   :  { %1517 = vst [vmem:[#allocation15 + $0xb8] sm:$0xff] %v1459_v2 }
 0x4f4   :  { %1515 = vst [vmem:[#allocation15 + $0xa8] sm:$0xff] %v1451_v6 }
 0x4fe   :  { %v2077_v4 = vpop.f32.mrb[92].mxu0 }
 0x4ff   :  { %v1472_v10 = vadd.f32 %v2077_v4, %v2673_v57  ;;  %v1463_v13 = vpop.f32.mrb[93].mxu0 }
 0x500   :  { %v1464_v15 = vadd.f32 %v1463_v13, %v2673_v57  ;;  %v2078_v16 = vpop.f32.mrb[94].mxu0 }
 0x501   :  { %1520 = vst [vmem:[#allocation15 + $0xd0] sm:$0xff] %v1472_v10  ;;  %v1475_v53 = vadd.f32 %v2078_v16, %v2673_v57  ;;  %v1466_v18 = vpop.f32.mrb[95].mxu0 }
 0x502   :  { %1518 = vst [vmem:[#allocation15 + $0xc0] sm:$0xff] %v1464_v15  ;;  %v1467_v52 = vadd.f32 %v1466_v18, %v2673_v57 }
 0x503   :  { %1521 = vst [vmem:[#allocation15 + $0xd8] sm:$0xff] %v1475_v53 }
 0x504   :  { %1519 = vst [vmem:[#allocation15 + $0xc8] sm:$0xff] %v1467_v52 }
 0x50e   :  { %v2081_v26 = vpop.f32.mrb[96].mxu0 }
 0x50f   :  { %v1488_v27 = vadd.f32 %v2081_v26, %v2673_v57  ;;  %v1479_v28 = vpop.f32.mrb[97].mxu0 }
 0x510   :  { %v1480_v31 = vadd.f32 %v1479_v28, %v2673_v57  ;;  %v2082_v48 = vpop.f32.mrb[98].mxu0 }
 0x511   :  { %1524 = vst [vmem:[#allocation15 + $0xf0] sm:$0xff] %v1488_v27  ;;  %v1491_v49 = vadd.f32 %v2082_v48, %v2673_v57  ;;  %v1482_v50 = vpop.f32.mrb[99].mxu0 }
 0x512   :  { %1522 = vst [vmem:[#allocation15 + $0xe0] sm:$0xff] %v1480_v31  ;;  %v1483_v55 = vadd.f32 %v1482_v50, %v2673_v57 }
 0x513   :  { %1525 = vst [vmem:[#allocation15 + $0xf8] sm:$0xff] %v1491_v49 }
 0x514   :  { %1523 = vst [vmem:[#allocation15 + $0xe8] sm:$0xff] %v1483_v55 }
 0x515   :  { %2368 = shalt.err (!%p2365_p10)
}
 0x516   :  { %s2369_s17 = scalar_lea.hbm %s2810_s10, 4096 }
 0x517   :  { %p2370_p11 = scmp.ne.s32.totalorder %s2810_s10, %s2369_s17  ;;  %p2373_p12 = scmp.lt.u32.totalorder %s2369_s17, %s2810_s10 }
 0x519   :  { %p2375_p13 = pnand %p2373_p12, %p2370_p11 }
 0x51b   :  { %2378 = shalt.err (!%p2375_p13)
}
 0x51c   :  { %1537 = dma.vmem_to_hbm [thread:$0]  %s1532_s9, 4096, %s2810_s10, [#allocation6], %s2390_s23, %s2390_s23, %s2391_s24  }
 0x51d   :  { %2387 = dma.done.wait [#allocation6], 4096  }
 0x51e   :  { %2388 = vsyncadd [#allocation6], 4294963200 }
 0x51f   :  { %1541 = vsyncpa [#allocation5], 1 }
 0x520   :  { %1542 = vsyncpa [#allocation8], 1 }
 0x521   :  { %1543 = vsyncpa [#allocation11], 1 }
 0x522   :  { %1544 = vsyncpa [#allocation14], 1 }
 0x523   :  { %1545 = vsyncpa [#allocation6], 1 }

</bundles_post_ra>
